<compile_context>
chip_gen: v6e
topology: v6e:2x2x1
jax: 0.10.0
libtpu: 0.0.40
codegen_flags: <defaults>
</compile_context>

<pallas_src>
import functools
import math

import jax
import jax.numpy as jnp
from jax.experimental import pallas as pl
from jax.experimental.pallas import tpu as pltpu

_INV_SQRT2 = 1.0 / math.sqrt(2.0)


def _haar_block_weight(tl, dtype):
    """(2*tl, 2*tl) block of the stride-2 db1 synthesis matrix, taps folded to +/-1.

    Rows [0, tl)   : lowpass  A contribution (rec_lo = [+1, +1] up to 1/sqrt2)
    Rows [tl, 2tl) : highpass D contribution (rec_hi = [+1, -1] up to 1/sqrt2)
    Columns 2j / 2j+1 are the even / odd reconstructed samples of lane j.
    The common 1/sqrt(2) factor is applied on the VPU after the matmul, so the
    weight entries are exact in bf16 as well as f32.
    """
    rows = jnp.arange(tl)
    w = jnp.zeros((2 * tl, 2 * tl), jnp.float32)
    w = w.at[rows, 2 * rows].set(1.0)
    w = w.at[rows, 2 * rows + 1].set(1.0)
    w = w.at[tl + rows, 2 * rows].set(1.0)
    w = w.at[tl + rows, 2 * rows + 1].set(-1.0)
    return w.astype(dtype)


def _idwt_kernel(a_ref, d_ref, w_ref, o_ref, *, precision):
    # Lane concat at a 128-aligned boundary (tl is always a multiple of 128):
    # pure vreg placement, no cross-lane shuffles.
    x = jnp.concatenate([a_ref[...], d_ref[...]], axis=-1)          # (tb, 2*tl)
    acc = jnp.dot(x, w_ref[...], preferred_element_type=jnp.float32,
                  precision=precision)                               # (tb, 2*tl) f32
    o_ref[...] = (acc * _INV_SQRT2).astype(o_ref.dtype)


def _choose_row_tile(B, tl, in_itemsize, out_itemsize,
                     vmem_budget_bytes=24 * 1024 * 1024, max_rows=4096):
    """Largest row tile (multiple of 8) whose pipelined VMEM footprint fits.

    Accounts for the double-buffered A/D/out blocks, the resident weight
    buffers, and the concat / f32-accumulator temporaries.  The budget is
    chosen to stay well under v7x's 64 MiB physical VMEM while amortizing the
    ~0.35 us per-grid-step overhead on v5e/v6e.
    """
    weight_bytes = 2 * (2 * tl) * (2 * tl) * in_itemsize      # 2 pipeline buffers
    budget = max(vmem_budget_bytes - weight_bytes, 1 << 20)
    per_row = (4 * tl * in_itemsize        # A + D blocks, double-buffered
               + 4 * tl * out_itemsize     # out block, double-buffered
               + 2 * tl * in_itemsize      # concat temporary
               + 2 * tl * 4)               # f32 accumulator temporary
    tb = int(budget // per_row)
    tb = max(8, min(tb, max_rows))
    tb = (tb // 8) * 8
    if B <= tb:
        tb = B                             # full-extent block is always legal
    if B >= 16 and (B + tb - 1) // tb < 2:
        # Keep >= 2 row blocks so the leading "parallel" axis can be sharded
        # across v7x's two TensorCores (no effect on single-TC v5e/v6e).
        tb = max(8, ((B // 2) // 8) * 8)
    return tb


def idwt1d(x, wave="db1"):
    # TODO(synk): only db1/Haar synthesis filters are built in-script; longer
    # wavelets need a pywt filter table and halo overlap between lane tiles.
    assert wave == "db1", "only db1 (Haar) filters are built in-script"
    a, d = x
    assert a.shape == d.shape and a.ndim == 3
    N, C, L = a.shape
    dtype = a.dtype
    B = N * C

    a2 = a.reshape(B, L)
    d2 = d.reshape(B, L)

    # Lane tiles are always 128-aligned so the weight stays O(tl^2) (never the
    # dense (L, 2L) matrix) and output stores are lane-dense (256/512 wide,
    # unmasked).  Non-multiple-of-128 lengths are zero-padded in the wrapper
    # and the pad is sliced off afterwards.
    Lp = ((L + 127) // 128) * 128
    tl = 256 if Lp % 256 == 0 else 128
    if Lp != L:
        pad = ((0, 0), (0, Lp - L))
        a2 = jnp.pad(a2, pad)
        d2 = jnp.pad(d2, pad)

    itemsize = jnp.dtype(dtype).itemsize
    tb = _choose_row_tile(B, tl, itemsize, itemsize)

    # +/-1 weights (exact in bf16 and f32); the 1/sqrt(2) scale runs on the VPU.
    w = _haar_block_weight(tl, dtype)

    # Explicit matmul precision: exact f32 for f32 inputs; default single-pass
    # for bf16 (the +/-1 weights are exact in bf16, so no tap rounding error).
    precision = (jax.lax.Precision.HIGHEST
                 if jnp.dtype(dtype) == jnp.float32 else None)

    grid = ((B + tb - 1) // tb, Lp // tl)

    out2 = pl.pallas_call(
        functools.partial(_idwt_kernel, precision=precision),
        out_shape=jax.ShapeDtypeStruct((B, 2 * Lp), dtype),
        grid=grid,
        in_specs=[
            pl.BlockSpec((tb, tl), lambda i, j: (i, j)),
            pl.BlockSpec((tb, tl), lambda i, j: (i, j)),
            pl.BlockSpec((2 * tl, 2 * tl), lambda i, j: (0, 0)),  # resident, tiny
        ],
        out_specs=pl.BlockSpec((tb, 2 * tl), lambda i, j: (i, j)),
        compiler_params=pltpu.CompilerParams(
            dimension_semantics=("parallel", "parallel"),
            vmem_limit_bytes=48 * 1024 * 1024,
        ),
    )(a2, d2, w)

    if Lp != L:
        out2 = out2[:, : 2 * L]
    return out2.reshape(N, C, 2 * L)


class IDWT1D:
    """JAX/Pallas equivalent of the PyTorch IDWT1D module (1-level inverse DWT)."""

    def __init__(self, wave="db1"):
        self.wave = wave

    def __call__(self, x):
        return idwt1d(x, self.wave)


if __name__ == "__main__":
    mod = IDWT1D("db1")
    s = 1.0 / math.sqrt(2.0)

    # 1) Small shape (L not a multiple of 128 -> padded lane path, tl = 128).
    ka, kd = jax.random.split(jax.random.PRNGKey(0))
    N, C, L = 2, 4, 16
    A = jax.random.normal(ka, (N, C, L), dtype=jnp.float32)
    D = jax.random.normal(kd, (N, C, L), dtype=jnp.float32)
    out = jax.block_until_ready(mod((A, D)))
    assert out.shape == (N, C, 2 * L)
    ref = jnp.stack([(A + D) * s, (A - D) * s], axis=-1).reshape(N, C, 2 * L)
    assert jnp.allclose(out, ref, atol=1e-5, rtol=1e-5)

    # 2) 256-wide lane tile (tl = 256) and >= 2 row blocks (megacore split).
    ka2, kd2 = jax.random.split(jax.random.PRNGKey(1))
    N2, C2, L2 = 2, 8, 256
    A2 = jax.random.normal(ka2, (N2, C2, L2), dtype=jnp.float32)
    D2 = jax.random.normal(kd2, (N2, C2, L2), dtype=jnp.float32)
    out2 = jax.block_until_ready(mod((A2, D2)))
    assert out2.shape == (N2, C2, 2 * L2)
    ref2 = jnp.stack([(A2 + D2) * s, (A2 - D2) * s], axis=-1).reshape(N2, C2, 2 * L2)
    assert jnp.allclose(out2, ref2, atol=1e-5, rtol=1e-5)

    # 3) bf16 path: exact +/-1 bf16 weights, single-pass MXU, f32 scale.
    ka3, kd3 = jax.random.split(jax.random.PRNGKey(2))
    N3, C3, L3 = 2, 8, 128
    A3 = jax.random.normal(ka3, (N3, C3, L3), dtype=jnp.bfloat16)
    D3 = jax.random.normal(kd3, (N3, C3, L3), dtype=jnp.bfloat16)
    out3 = jax.block_until_ready(mod((A3, D3)))
    assert out3.shape == (N3, C3, 2 * L3)
    A3f, D3f = A3.astype(jnp.float32), D3.astype(jnp.float32)
    ref3 = jnp.stack([(A3f + D3f) * s, (A3f - D3f) * s], axis=-1).reshape(N3, C3, 2 * L3)
    assert jnp.allclose(out3.astype(jnp.float32), ref3, atol=1e-2, rtol=1e-2)

    print("KERNEL_OK")
</pallas_src>

<mosaic_0001>
module attributes {stable_mosaic.version = 11 : i64} {
  func.func @_idwt_kernel(%arg0: i32, %arg1: i32, %arg2: memref<8x128xf32, #tpu.memory_space<vmem>>, %arg3: memref<8x128xf32, #tpu.memory_space<vmem>>, %arg4: memref<256x256xf32, #tpu.memory_space<vmem>>, %arg5: memref<8x256xf32, #tpu.memory_space<vmem>>) attributes {dimension_semantics = [#tpu.dimension_semantics<parallel>, #tpu.dimension_semantics<parallel>], iteration_bounds = array<i64: 1, 1>, scalar_prefetch = 0 : i64, scratch_operands = 0 : i64, tpu.core_type = #tpu.core_type<tc>, window_params = [{transform_indices = @transform_0, window_bounds = array<i64: 8, 128>}, {transform_indices = @transform_1, window_bounds = array<i64: 8, 128>}, {pipeline_mode = #tpu.pipeline_mode<synchronous>, transform_indices = @transform_2, window_bounds = array<i64: 256, 256>}, {transform_indices = @transform_3, window_bounds = array<i64: 8, 256>}]} {
    %c0 = arith.constant 0 : index
    %c0_0 = arith.constant 0 : index
    %0 = vector.load %arg2[%c0, %c0_0] : memref<8x128xf32, #tpu.memory_space<vmem>>, vector<8x128xf32>
    %c0_1 = arith.constant 0 : index
    %c0_2 = arith.constant 0 : index
    %1 = vector.load %arg3[%c0_1, %c0_2] : memref<8x128xf32, #tpu.memory_space<vmem>>, vector<8x128xf32>
    %2 = tpu.concatenate %0, %1 in 1 : vector<8x128xf32>, vector<8x128xf32> -> vector<8x256xf32>
    %c0_3 = arith.constant 0 : index
    %c0_4 = arith.constant 0 : index
    %3 = vector.load %arg4[%c0_3, %c0_4] : memref<256x256xf32, #tpu.memory_space<vmem>>, vector<256x256xf32>
    %cst = arith.constant dense<0.000000e+00> : vector<8x256xf32>
    %4 = tpu.matmul %2, %3, %cst {dimension_numbers = #tpu.dot_dimension_numbers<[1], [0], [0], [1], [0, 0, 1, 1], [], []>, precision = #tpu.contract_precision<fp32>} : vector<8x256xf32>, vector<256x256xf32>, vector<8x256xf32> -> vector<8x256xf32>
    %cst_5 = arith.constant 0.707106769 : f32
    %5 = vector.broadcast %cst_5 : f32 to vector<8x256xf32>
    %6 = arith.mulf %4, %5 : vector<8x256xf32>
    %c0_6 = arith.constant 0 : index
    %c0_7 = arith.constant 0 : index
    %7 = vector.load %arg5[%c0_6, %c0_7] : memref<8x256xf32, #tpu.memory_space<vmem>>, vector<8x256xf32>
    tpu.vector_store %arg5[%c0_6, %c0_7], %6 {strides = array<i32>} : memref<8x256xf32, #tpu.memory_space<vmem>>, vector<8x256xf32>,
    return
  }
  func.func @transform_0(%arg0: i32, %arg1: i32) -> (i32, i32) {
    %c0_i32 = arith.constant 0 : i32
    return %arg0, %arg1 : i32, i32
  }
  func.func @transform_1(%arg0: i32, %arg1: i32) -> (i32, i32) {
    %c0_i32 = arith.constant 0 : i32
    return %arg0, %arg1 : i32, i32
  }
  func.func @transform_2(%arg0: i32, %arg1: i32) -> (i32, i32) {
    %c0_i32 = arith.constant 0 : i32
    %c0_i32_0 = arith.constant 0 : i32
    %c0_i32_1 = arith.constant 0 : i32
    return %c0_i32, %c0_i32_0 : i32, i32
  }
  func.func @transform_3(%arg0: i32, %arg1: i32) -> (i32, i32) {
    %c0_i32 = arith.constant 0 : i32
    return %arg0, %arg1 : i32, i32
  }
}

</mosaic_0001>

<bundles_post_ra>
// kernel: tpu_custom_call.1
= control target key start
LH: loop header
LB: loop body
LE: loop exit
PB: predicated region body
PF: predicated region fallthrough
CT: control target
= control target key end

     0   :  { %8 = vsyncpa [#allocation3], 0  ;;  %s2762_s0 = inlined_call_operand.hbm [shape: f32[8,128], index: 0, kind: input, shape index: {}]   ;;  %s2763_s1 = inlined_call_operand.hbm [shape: f32[8,128], index: 1, kind: input, shape index: {}]   ;;  %s2764_s2 = inlined_call_operand.hbm [shape: f32[256,256], index: 2, kind: input, shape index: {}]   ;;  %s2765_s3 = inlined_call_operand.hbm [shape: f32[8,256], index: 3, kind: output, shape index: {}]  }
   0x1   :  { %9 = vsyncpa [#allocation6], 0 }
   0x2   :  { %10 = vsyncpa [#allocation4], 0  ;;  %s1514_s12 = smov [#allocation5]   ;;  %s1515_s14 = smov [#allocation2]  }
   0x3   :  { %s27_s13 = sshll.u32 %s1514_s12, 4  ;;  %s17_s15 = sshll.u32 %s1515_s14, 4  ;;  %s28_s13 = int_to_ptr.vmem [resolvable:$true] %s27_s13  ;;  %s18_s15 = int_to_ptr.vmem [resolvable:$true] %s17_s15 }
   0x4   :  { %s1436_s16 = scalar_lea.vmem %s28_s13, 128  ;;  %p1441_p1 = scmp.lt.s32.totalorder %s28_s13, %s28_s13 }
   0x5   :  { %p1437_p0 = scmp.ne.s32.totalorder %s28_s13, %s1436_s16  ;;  %p1442_p2 = scmp.lt.s32.totalorder %s1436_s16, %s1436_s16 }
   0x7   :  { %p1443_p3 = por %p1442_p2, %p1441_p1 }
   0x9   :  { %p1444_p4 = pnand %p1443_p3, %p1437_p0 }
   0xb   :  { %1447 = shalt.err (!%p1444_p4)
}
   0xc   :  { %30 = dma.hbm_to_vmem [thread:$0]  %s2763_s1, 128, %s28_s13, [#allocation6]  }
   0xd   :  { %s1456_s19 = scalar_lea.vmem %s18_s15, 128  ;;  %p1461_p6 = scmp.lt.s32.totalorder %s18_s15, %s18_s15 }
   0xe   :  { %p1457_p5 = scmp.ne.s32.totalorder %s18_s15, %s1456_s19  ;;  %p1462_p7 = scmp.lt.s32.totalorder %s1456_s19, %s1456_s19 }
  0x10   :  { %p1463_p8 = por %p1462_p7, %p1461_p6 }
  0x12   :  { %p1464_p9 = pnand %p1463_p8, %p1457_p5 }
  0x14   :  { %1467 = shalt.err (!%p1464_p9)
}
  0x15   :  { %20 = dma.hbm_to_vmem [thread:$0]  %s2762_s0, 128, %s18_s15, [#allocation3]  }
  0x16   :  { %s1516_s22 = smov [#allocation7]  }
  0x17   :  { %s36_s23 = sshll.u32 %s1516_s22, 4  ;;  %s37_s23 = int_to_ptr.vmem [resolvable:$true] %s36_s23 }
  0x18   :  { %s1476_s24 = scalar_lea.vmem %s37_s23, 8192  ;;  %p1481_p11 = scmp.lt.s32.totalorder %s37_s23, %s37_s23 }
  0x19   :  { %p1477_p10 = scmp.ne.s32.totalorder %s37_s23, %s1476_s24  ;;  %p1482_p12 = scmp.lt.s32.totalorder %s1476_s24, %s1476_s24 }
  0x1b   :  { %p1483_p13 = por %p1482_p12, %p1481_p11 }
  0x1d   :  { %p1484_p0 = pnand %p1483_p13, %p1477_p10 }
  0x1f   :  { %1487 = shalt.err (!%p1484_p0)
}
  0x20   :  { %s1517_s1 = smov 256   ;;  %s1518_s25 = smov 16  }
  0x21   :  { %42 = dma.hbm_to_vmem [thread:$0]  %s2764_s2, 8192, %s37_s23, [#allocation6], %s1517_s1, %s1517_s1, %s1518_s25  }
  0x22   :  { %1508 = dma.done.wait [#allocation3], 128  }
  0x23   :  { %1509 = vsyncadd [#allocation3], 4294967168 }
  0x24   :  { %1510 = dma.done.wait [#allocation6], 8320  }
  0x25   :  { %1511 = vsyncadd [#allocation6], 4294958976  ;;  %v85_v0 = vld [vmem:[#allocation7 + $0xf8] sm:$0xff]  ;;  %v84_v1 = vld [vmem:[#allocation7 + $0xf0] sm:$0xff]  ;;  %s1519_s0 = smov [#allocation8]  }
  0x26   :  { %v83_v2 = vld [vmem:[#allocation7 + $0xe8] sm:$0xff]  ;;  %v1549_v3 = vand.u32 4294901760, %v85_v0  ;;  %v1551_v4 = vand.u32 4294901760, %v84_v1  ;;  %v82_v6 = vld [vmem:[#allocation7 + $0xe0] sm:$0xff]  ;;  %v81_v7 = vld [vmem:[#allocation7 + $0xd8] sm:$0xff]  ;;  %s1412_s2 = sshll.u32 %s1519_s0, 4  ;;  %s1413_s2 = int_to_ptr.vmem [resolvable:$true] %s1412_s2 }
  0x27   :  { %v1553_v5 = vand.u32 4294901760, %v83_v2  ;;  %v80_v8 = vld [vmem:[#allocation7 + $0xd0] sm:$0xff]  ;;  %v1555_v9 = vand.u32 4294901760, %v82_v6  ;;  %v1557_v10 = vand.u32 4294901760, %v81_v7  ;;  %v79_v12 = vld [vmem:[#allocation7 + $0xc8] sm:$0xff]  ;;  %v78_v13 = vld [vmem:[#allocation7 + $0xc0] sm:$0xff]  ;;  %p1493_p2 = scmp.lt.s32.totalorder %s1413_s2, %s1413_s2 }
  0x28   :  { %v1559_v11 = vand.u32 4294901760, %v80_v8  ;;  %v77_v14 = vld [vmem:[#allocation7 + $0xb8] sm:$0xff]  ;;  %119 = vmatprep.subr.mxu0 %v1549_v3  ;;  %v1562_v15 = vand.u32 4294901760, %v79_v12  ;;  %v1564_v16 = vand.u32 4294901760, %v78_v13  ;;  %v1569_v18 = vsub.f32 %v85_v0, %v1549_v3  ;;  %v1571_v19 = vld [vmem:[#allocation7 + $0xb0] sm:$0xff]  ;;  %v1573_v20 = vld [vmem:[#allocation7 + $0xa8] sm:$0xff] }
  0x29   :  { %v1566_v17 = vand.u32 4294901760, %v77_v14  ;;  %v1575_v21 = vld [vmem:[#allocation7 + $0xa0] sm:$0xff]  ;;  %121 = vmatpush1.msra.mxu0 %v1551_v4  ;;  %v1579_v22 = vand.u32 4294901760, %v1571_v19  ;;  %v1582_v23 = vsub.f32 %v84_v1, %v1551_v4  ;;  %v1585_v24 = vand.u32 4294901760, %v1573_v20  ;;  %v1590_v26 = vld [vmem:[#allocation7 + $0x98] sm:$0xff]  ;;  %v1592_v27 = vld [vmem:[#allocation7 + $0x90] sm:$0xff] }
  0x2a   :  { %v1588_v25 = vsub.f32 %v83_v2, %v1553_v5  ;;  %v1594_v28 = vld [vmem:[#allocation7 + $0x88] sm:$0xff]  ;;  %123 = vmatprep.subr.mxu0 %v1553_v5  ;;  %v2779_v29 = vand.u32 4294901760, %v1569_v18  ;;  %v1599_v30 = vand.u32 4294901760, %v1575_v21  ;;  %v1602_v31 = vsub.f32 %v82_v6, %v1555_v9  ;;  %v1616_v37 = vld [vmem:[#allocation7 + $0x80] sm:$0xff]  ;;  %v1640_v46 = vld [vmem:[#allocation7 + $0x78] sm:$0xff]  ;;  %s1488_s28 = scalar_lea.vmem %s1413_s2, 256 }
  0x2b   :  { %2979 = vst [vmem:[#allocation12_spill] sm:$0xff] %v1585_v24  ;;  %v1605_v32 = vand.u32 4294901760, %v1590_v26  ;;  %125 = vmatpush1.msra.mxu0 %v1555_v9  ;;  %v2777_v33 = vand.u32 4294901760, %v1582_v23  ;;  %v1611_v35 = vsub.f32 %v81_v7, %v1557_v10  ;;  %v1614_v36 = vand.u32 4294901760, %v1592_v27  ;;  %v1650_v51 = vld [vmem:[#allocation7 + $0x70] sm:$0xff]  ;;  %v1657_v56 = vld [vmem:[#allocation7 + $0x68] sm:$0xff]  ;;  %p1489_p1 = scmp.ne.s32.totalorder %s1413_s2, %s1488_s28  ;;  %p1494_p3 = scmp.lt.s32.totalorder %s1488_s28, %s1488_s28 }
  0x2c   :  { %2980 = vst [vmem:[#allocation13_spill] sm:$0xff] %v1599_v30  ;;  %v2776_v34 = vand.u32 4294901760, %v1588_v25  ;;  %127 = vmatprep.subr.mxu0 %v1557_v10  ;;  %v266_v38 = vsub.f32 %v1569_v18, %v2779_v29  ;;  %v2774_v39 = vand.u32 4294901760, %v1602_v31  ;;  %v1624_v40 = vsub.f32 %v80_v8, %v1559_v11  ;;  %v1669_v61 = vld [vmem:[#allocation7 + $0x60] sm:$0xff]  ;;  %v1681_v2 = vld [vmem:[#allocation7 + $0x58] sm:$0xff] }
  0x2d   :  { %2981 = vst [vmem:[#allocation14_spill] sm:$0xff] %v1605_v32  ;;  %2982 = vst [vmem:[#allocation15_spill] sm:$0xff] %v1614_v36  ;;  %v1627_v41 = vand.u32 4294901760, %v1594_v28  ;;  %129 = vmatpush1.msra.mxu0 %v1559_v11  ;;  %v272_v42 = vsub.f32 %v1582_v23, %v2777_v33  ;;  %v2772_v44 = vand.u32 4294901760, %v1611_v35  ;;  %v1638_v45 = vsub.f32 %v79_v12, %v1562_v15  ;;  %p1495_p4 = por %p1494_p3, %p1493_p2 }
  0x2e   :  { %v278_v43 = vsub.f32 %v1588_v25, %v2776_v34  ;;  %131 = vmatprep.subr.mxu0 %v1562_v15  ;;  %v267_v47 = vand.u32 4294901760, %v266_v38  ;;  %v284_v48 = vsub.f32 %v1602_v31, %v2774_v39  ;;  %v2771_v49 = vand.u32 4294901760, %v1624_v40  ;;  %v1772_v39 = vld [vmem:[#allocation7 + $0x28] sm:$0xff]  ;;  %v1782_v34 = vld [vmem:[#allocation7 + $0x20] sm:$0xff] }
  0x2f   :  { %2983 = vst [vmem:[#allocation16_spill] sm:$0xff] %v1627_v41  ;;  %v1648_v50 = vand.u32 4294901760, %v1616_v37  ;;  %133 = vmatpush1.msra.mxu0 %v1564_v16  ;;  %v273_v52 = vand.u32 4294901760, %v272_v42  ;;  %v290_v54 = vsub.f32 %v1611_v35, %v2772_v44  ;;  %v2769_v55 = vand.u32 4294901760, %v1638_v45  ;;  %p1496_p5 = pnand %p1495_p4, %p1489_p1 }
  0x30   :  { %v279_v53 = vand.u32 4294901760, %v278_v43  ;;  %135 = vmatprep.subr.mxu0 %v1566_v17  ;;  %268 = vmatprep.subr.mxu1 %v267_v47  ;;  %v285_v57 = vand.u32 4294901760, %v284_v48  ;;  %v296_v58 = vsub.f32 %v1624_v40, %v2771_v49  ;;  %v1664_v59 = vsub.f32 %v78_v13, %v1564_v16  ;;  %v1692_v13 = vld [vmem:[#allocation7 + $0x50] sm:$0xff] }
  0x31   :  { %2984 = vst [vmem:[#allocation17_spill] sm:$0xff] %v1648_v50  ;;  %v1667_v60 = vand.u32 4294901760, %v1640_v46  ;;  %137 = vmatpush1.msra.mxu0 %v1579_v22  ;;  %274 = vmatpush1.msra.mxu1 %v273_v52  ;;  %v291_v62 = vand.u32 4294901760, %v290_v54  ;;  %v302_v63 = vsub.f32 %v1638_v45, %v2769_v55  ;;  %v1676_v0 = vsub.f32 %v77_v14, %v1566_v17  ;;  %v1759_v49 = vld [vmem:[#allocation7 + $0x30] sm:$0xff] }
  0x32   :  { %v1679_v1 = vand.u32 4294901760, %v1650_v51  ;;  %139 = vmatprep.subr.mxu0 %v1585_v24  ;;  %280 = vmatprep.subr.mxu1 %v279_v53  ;;  %v297_v6 = vand.u32 4294901760, %v296_v58  ;;  %v2767_v7 = vand.u32 4294901760, %v1664_v59  ;;  %v1687_v8 = vsub.f32 %v1571_v19, %v1579_v22 }
  0x33   :  { %2985 = vst [vmem:[#allocation18_spill] sm:$0xff] %v1667_v60  ;;  %v1690_v12 = vand.u32 4294901760, %v1657_v56  ;;  %141 = vmatpush1.msra.mxu0 %v1599_v30  ;;  %286 = vmatpush1.msra.mxu1 %v285_v57  ;;  %v303_v14 = vand.u32 4294901760, %v302_v63  ;;  %v2766_v38 = vand.u32 4294901760, %v1676_v0  ;;  %v1698_v42 = vsub.f32 %v1573_v20, %v1585_v24  ;;  %v1715_v20 = vld [vmem:[#allocation7 + $0x48] sm:$0xff] }
  0x34   :  { %2986 = vst [vmem:[#allocation19_spill] sm:$0xff] %v1679_v1  ;;  %v1701_v43 = vand.u32 4294901760, %v1669_v61  ;;  %143 = vmatprep.subr.mxu0 %v1605_v32  ;;  %292 = vmatprep.subr.mxu1 %v291_v62  ;;  %v308_v19 = vsub.f32 %v1664_v59, %v2767_v7  ;;  %v2768_v47 = vand.u32 4294901760, %v1687_v8  ;;  %v1710_v48 = vsub.f32 %v1575_v21, %v1599_v30 }
  0x35   :  { %2987 = vst [vmem:[#allocation20_spill] sm:$0xff] %v1690_v12  ;;  %v1713_v52 = vand.u32 4294901760, %v1681_v2  ;;  %145 = vmatpush1.msra.mxu0 %v1614_v36  ;;  %298 = vmatpush1.msra.mxu1 %v297_v6  ;;  %v314_v53 = vsub.f32 %v1676_v0, %v2766_v38  ;;  %v2770_v54 = vand.u32 4294901760, %v1698_v42  ;;  %v1724_v57 = vsub.f32 %v1590_v26, %v1605_v32  ;;  %v1738_v38 = vld [vmem:[#allocation7 + $0x40] sm:$0xff] }
  0x36   :  { %2988 = vst [vmem:[#allocation21_spill] sm:$0xff] %v1701_v43  ;;  %v1727_v21 = vand.u32 4294901760, %v1692_v13  ;;  %147 = vmatprep.subr.mxu0 %v1627_v41  ;;  %304 = vmatprep.subr.mxu1 %v303_v14  ;;  %v309_v58 = vand.u32 4294901760, %v308_v19  ;;  %v320_v62 = vsub.f32 %v1687_v8, %v2768_v47  ;;  %v2773_v63 = vand.u32 4294901760, %v1710_v48  ;;  %v1748_v47 = vld [vmem:[#allocation7 + $0x38] sm:$0xff] }
  0x37   :  { %2989 = vst [vmem:[#allocation22_spill] sm:$0xff] %v1713_v52  ;;  %v1736_v6 = vsub.f32 %v1592_v27, %v1614_v36  ;;  %149 = vmatpush1.msra.mxu0 %v1648_v50  ;;  %v315_v26 = vand.u32 4294901760, %v314_v53  ;;  %v326_v14 = vsub.f32 %v1698_v42, %v2770_v54  ;;  %v2775_v19 = vand.u32 4294901760, %v1724_v57  ;;  %v1862_v36 = vld [vmem:[#allocation7 + $0x1f8] sm:$0xff] }
  0x38   :  { %2990 = vst [vmem:[#allocation23_spill] sm:$0xff] %v1727_v21  ;;  %v1746_v7 = vand.u32 4294901760, %v1715_v20  ;;  %310 = vmatpush1.msra.mxu1 %v309_v58  ;;  %151 = vmatprep.subr.mxu0 %v1667_v60  ;;  %v321_v27 = vand.u32 4294901760, %v320_v62  ;;  %v332_v55 = vsub.f32 %v1710_v48, %v2773_v63  ;;  %v1757_v54 = vsub.f32 %v1594_v28, %v1627_v41 }
  0x39   :  { %v2778_v53 = vand.u32 4294901760, %v1736_v6  ;;  %316 = vmatprep.subr.mxu1 %v315_v26  ;;  %153 = vmatpush1.msra.mxu0 %v1679_v1  ;;  %v327_v44 = vand.u32 4294901760, %v326_v14  ;;  %v338_v58 = vsub.f32 %v1724_v57, %v2775_v19  ;;  %v1766_v62 = vand.u32 4294901760, %v1738_v38 }
  0x3a   :  { %2991 = vst [vmem:[#allocation24_spill] sm:$0xff] %v1746_v7  ;;  %v1770_v63 = vsub.f32 %v1616_v37, %v1648_v50  ;;  %322 = vmatpush1.msra.mxu1 %v321_v27  ;;  %155 = vmatprep.subr.mxu0 %v1690_v12  ;;  %v333_v28 = vand.u32 4294901760, %v332_v55  ;;  %v2782_v14 = vand.u32 4294901760, %v1757_v54  ;;  %v1780_v19 = vand.u32 4294901760, %v1748_v47 }
  0x3b   :  { %2992 = vst [vmem:[#allocation25_spill] sm:$0xff] %v1766_v62  ;;  %v344_v26 = vsub.f32 %v1736_v6, %v2778_v53  ;;  %328 = vmatprep.subr.mxu1 %v327_v44  ;;  %157 = vmatpush1.msra.mxu0 %v1701_v43  ;;  %v339_v37 = vand.u32 4294901760, %v338_v58  ;;  %v1788_v55 = vsub.f32 %v1640_v46, %v1667_v60  ;;  %v1791_v33 = vand.u32 4294901760, %v1759_v49  ;;  %v1793_v53 = vld [vmem:[#allocation7 + $0x18] sm:$0xff] }
  0x3c   :  { %2993 = vst [vmem:[#allocation26_spill] sm:$0xff] %v1780_v19  ;;  %v2785_v27 = vand.u32 4294901760, %v1770_v63  ;;  %334 = vmatpush1.msra.mxu1 %v333_v28  ;;  %159 = vmatprep.subr.mxu0 %v1713_v52  ;;  %v350_v44 = vsub.f32 %v1757_v54, %v2782_v14  ;;  %v1801_v58 = vsub.f32 %v1650_v51, %v1679_v1  ;;  %v1804_v46 = vand.u32 4294901760, %v1772_v39  ;;  %v1818_v51 = vld [vmem:[#allocation7 + $0x10] sm:$0xff] }
  0x3d   :  { %2994 = vst [vmem:[#allocation27_spill] sm:$0xff] %v1791_v33  ;;  %v345_v29 = vand.u32 4294901760, %v344_v26  ;;  %340 = vmatprep.subr.mxu1 %v339_v37  ;;  %161 = vmatpush1.msra.mxu0 %v1727_v21  ;;  %v1813_v60 = vsub.f32 %v1657_v56, %v1690_v12  ;;  %v1816_v14 = vand.u32 4294901760, %v1782_v34  ;;  %v1827_v26 = vand.u32 4294901760, %v1793_v53  ;;  %v1829_v56 = vld [vmem:[#allocation7 + $0x8] sm:$0xff] }
  0x3e   :  { %2995 = vst [vmem:[#allocation28_spill] sm:$0xff] %v1804_v46  ;;  %v356_v28 = vsub.f32 %v1770_v63, %v2785_v27  ;;  %163 = vmatprep.subr.mxu0 %v1746_v7  ;;  %v351_v37 = vand.u32 4294901760, %v350_v44  ;;  %v1824_v27 = vsub.f32 %v1669_v61, %v1701_v43  ;;  %v2999_v50 = vand.u32 4294901760, %v1788_v55  ;;  %v1852_v44 = vld [vmem:[#allocation7] sm:$0xff] }
  0x3f   :  { %2996 = vst [vmem:[#allocation29_spill] sm:$0xff] %v1816_v14  ;;  %346 = vmatpush1.msra.mxu1 %v345_v29  ;;  %2998 = vst [vmem:[#allocation31_spill] sm:$0xff] %v1827_v26  ;;  %165 = vmatpush1.msra.mxu0 %v1766_v62  ;;  %v1838_v1 = vsub.f32 %v1681_v2, %v1713_v52  ;;  %v3001_v61 = vand.u32 4294901760, %v1801_v58  ;;  %v1860_v41 = vand.u32 4294901760, %v1829_v56  ;;  %v1880_v24 = vand.u32 4294901760, %v1852_v44 }
  0x40   :  { %2997 = vst [vmem:[#allocation30_spill] sm:$0xff] %v1824_v27  ;;  %v357_v12 = vand.u32 4294901760, %v356_v28  ;;  %v362_v29 = vsub.f32 %v1788_v55, %v2999_v50  ;;  %352 = vmatprep.subr.mxu1 %v351_v37  ;;  %167 = vmatprep.subr.mxu0 %v1780_v19  ;;  %v1846_v28 = vand.u32 4294901760, %v1818_v51  ;;  %v1850_v50 = vsub.f32 %v1692_v13, %v1727_v21 }
  0x41   :  { %3000 = vst [vmem:[#allocation32_spill] sm:$0xff] %v1838_v1  ;;  %v368_v43 = vsub.f32 %v1801_v58, %v3001_v61  ;;  %169 = vmatpush1.msra.mxu0 %v1791_v33  ;;  %v3004_v37 = vand.u32 4294901760, %v1813_v60  ;;  %3005 = vst [vmem:[#allocation35_spill] sm:$0xff] %v1860_v41  ;;  %v3006_v13 = vand.u32 4294901760, %v1824_v27  ;;  %v1871_v21 = vsub.f32 %v1715_v20, %v1746_v7 }
  0x42   :  { %3002 = vst [vmem:[#allocation33_spill] sm:$0xff] %v1846_v28  ;;  %3003 = vst [vmem:[#allocation34_spill] sm:$0xff] %v1850_v50  ;;  %358 = vmatpush1.msra.mxu1 %v357_v12  ;;  %v363_v2 = vand.u32 4294901760, %v362_v29  ;;  %171 = vmatprep.subr.mxu0 %v1804_v46  ;;  %v1886_v29 = vld [vmem:[#allocation7 + $0x1e8] sm:$0xff] }
  0x43   :  { %v374_v52 = vsub.f32 %v1813_v60, %v3004_v37  ;;  %v369_v32 = vand.u32 4294901760, %v368_v43  ;;  %v380_v12 = vsub.f32 %v1824_v27, %v3006_v13  ;;  %3007 = vst [vmem:[#allocation36_spill] sm:$0xff] %v1871_v21  ;;  %v1873_v37 = vld [vmem:[#allocation7 + $0x1f0] sm:$0xff]  ;;  %173 = vmatpush1.msra.mxu0 %v1816_v14  ;;  %v3008_v43 = vand.u32 4294901760, %v1838_v1  ;;  %3009 = vst [vmem:[#allocation37_spill] sm:$0xff] %v1880_v24 }
  0x44   :  { %364 = vmatprep.subr.mxu1 %v363_v2  ;;  %v1884_v13 = vsub.f32 %v1738_v38, %v1766_v62  ;;  %175 = vmatprep.subr.mxu0 %v1827_v26  ;;  %v1905_v62 = vand.u32 4294901760, %v1873_v37 }
  0x45   :  { %v375_v61 = vand.u32 4294901760, %v374_v52  ;;  %v386_v30 = vsub.f32 %v1838_v1, %v3008_v43  ;;  %370 = vmatpush1.msra.mxu1 %v369_v32  ;;  %v381_v20 = vand.u32 4294901760, %v380_v12  ;;  %v3011_v52 = vand.u32 4294901760, %v1850_v50  ;;  %v1896_v1 = vld [vmem:[#allocation7 + $0x1e0] sm:$0xff]  ;;  %177 = vmatpush1.msra.mxu0 %v1846_v28 }
  0x46   :  { %3010 = vst [vmem:[#allocation38_spill] sm:$0xff] %v1884_v13  ;;  %v1894_v43 = vand.u32 4294901760, %v1862_v36  ;;  %v1902_v12 = vsub.f32 %v1748_v47, %v1780_v19  ;;  %3014 = vst [vmem:[#allocation41_spill] sm:$0xff] %v1905_v62  ;;  %179 = vmatprep.subr.mxu0 %v1860_v41  ;;  %v1915_v32 = vsub.f32 %v1759_v49, %v1791_v33  ;;  %v1918_v47 = vand.u32 4294901760, %v1886_v29  ;;  %v1932_v49 = vld [vmem:[#allocation7 + $0x1d0] sm:$0xff] }
  0x47   :  { %v392_v2 = vsub.f32 %v1850_v50, %v3011_v52  ;;  %376 = vmatprep.subr.mxu1 %v375_v61  ;;  %v387_v38 = vand.u32 4294901760, %v386_v30  ;;  %v1907_v52 = vld [vmem:[#allocation7 + $0x1d8] sm:$0xff]  ;;  %v3015_v61 = vand.u32 4294901760, %v1871_v21  ;;  %181 = vmatpush1.msra.mxu0 %v1880_v24  ;;  %v3018_v19 = vand.u32 4294901760, %v1884_v13 }
  0x48   :  { %3012 = vst [vmem:[#allocation39_spill] sm:$0xff] %v1894_v43  ;;  %3013 = vst [vmem:[#allocation40_spill] sm:$0xff] %v1902_v12  ;;  %382 = vmatpush1.msra.mxu1 %v381_v20  ;;  %v1927_v50 = vsub.f32 %v1772_v39, %v1804_v46  ;;  %183 = vmatprep.subr.mxu0 %v1894_v43  ;;  %v1943_v39 = vld [vmem:[#allocation7 + $0x1c8] sm:$0xff] }
  0x49   :  { %v393_v7 = vand.u32 4294901760, %v392_v2  ;;  %v398_v30 = vsub.f32 %v1871_v21, %v3015_v61  ;;  %3016 = vst [vmem:[#allocation42_spill] sm:$0xff] %v1915_v32  ;;  %3017 = vst [vmem:[#allocation43_spill] sm:$0xff] %v1918_v47  ;;  %388 = vmatprep.subr.mxu1 %v387_v38  ;;  %v404_v20 = vsub.f32 %v1884_v13, %v3018_v19  ;;  %v1930_v61 = vand.u32 4294901760, %v1896_v1 }
  0x4a   :  { %3019 = vst [vmem:[#allocation44_spill] sm:$0xff] %v1927_v50  ;;  %v2828_v38 = vand.u32 4294901760, %v1915_v32  ;;  %v1938_v19 = vsub.f32 %v1782_v34, %v1816_v14  ;;  %v1941_v2 = vand.u32 4294901760, %v1907_v52  ;;  %v3023_v13 = vand.u32 4294901760, %v1902_v12  ;;  %185 = vmatpush2.msra.mxu0 %v1905_v62 }
  0x4b   :  { %3020 = vst [vmem:[#allocation45_spill] sm:$0xff] %v1930_v61  ;;  %394 = vmatpush1.msra.mxu1 %v393_v7  ;;  %v399_v33 = vand.u32 4294901760, %v398_v30  ;;  %v405_v46 = vand.u32 4294901760, %v404_v20  ;;  %v1952_v30 = vsub.f32 %v1793_v53, %v1827_v26  ;;  %187 = vmatprep.subr.mxu0 %v1918_v47  ;;  %v1960_v14 = vand.u32 4294901760, %v1932_v49  ;;  %v1966_v7 = vld [vmem:[#allocation7 + $0x1c0] sm:$0xff] }
  0x4c   :  { %3021 = vst [vmem:[#allocation46_spill] sm:$0xff] %v1938_v19  ;;  %3022 = vst [vmem:[#allocation47_spill] sm:$0xff] %v1941_v2  ;;  %v410_v21 = vsub.f32 %v1902_v12, %v3023_v13  ;;  %v416_v34 = vsub.f32 %v1915_v32, %v2828_v38  ;;  %v1964_v13 = vsub.f32 %v1818_v51, %v1846_v28  ;;  %189 = vmatpush2.msra.mxu0 %v1930_v61  ;;  %v1976_v32 = vld [vmem:[#allocation7 + $0x1b8] sm:$0xff] }
  0x4d   :  { %3024 = vst [vmem:[#allocation48_spill] sm:$0xff] %v1952_v30  ;;  %400 = vmatprep.subr.mxu1 %v399_v33  ;;  %3025 = vst [vmem:[#allocation49_spill] sm:$0xff] %v1960_v14  ;;  %v3027_v33 = vand.u32 4294901760, %v1927_v50  ;;  %v1974_v20 = vand.u32 4294901760, %v1943_v39  ;;  %v3029_v51 = vand.u32 4294901760, %v1938_v19  ;;  %191 = vmatprep.subr.mxu0 %v1941_v2 }
  0x4e   :  { %3026 = vst [vmem:[#allocation50_spill] sm:$0xff] %v1964_v13  ;;  %406 = vmatpush1.msra.mxu1 %v405_v46  ;;  %v411_v53 = vand.u32 4294901760, %v410_v21  ;;  %v417_v12 = vand.u32 4294901760, %v416_v34  ;;  %v1985_v46 = vsub.f32 %v1829_v56, %v1860_v41  ;;  %193 = vmatpush2.msra.mxu0 %v1960_v14  ;;  %v1998_v21 = vsub.f32 %v1852_v44, %v1880_v24  ;;  %v2021_v24 = vld [vmem:[#allocation7 + $0x198] sm:$0xff] }
  0x4f   :  { %v422_v26 = vsub.f32 %v1927_v50, %v3027_v33  ;;  %3028 = vst [vmem:[#allocation51_spill] sm:$0xff] %v1974_v20  ;;  %v428_v28 = vsub.f32 %v1938_v19, %v3029_v51  ;;  %v1987_v33 = vld [vmem:[#allocation7 + $0x1b0] sm:$0xff]  ;;  %v3031_v50 = vand.u32 4294901760, %v1952_v30  ;;  %v1994_v51 = vand.u32 4294901760, %v1966_v7  ;;  %v2000_v19 = vld [vmem:[#allocation7 + $0x1a8] sm:$0xff]  ;;  %195 = vmatprep.subr.mxu0 %v1974_v20 }
  0x50   :  { %3030 = vst [vmem:[#allocation52_spill] sm:$0xff] %v1985_v46  ;;  %412 = vmatprep.subr.mxu1 %v411_v53  ;;  %3033 = vst [vmem:[#allocation54_spill] sm:$0xff] %v1998_v21  ;;  %v3034_v53 = vand.u32 4294901760, %v1964_v13  ;;  %v2008_v41 = vand.u32 4294901760, %v1976_v32 }
  0x51   :  { %v423_v38 = vand.u32 4294901760, %v422_v26  ;;  %v434_v34 = vsub.f32 %v1952_v30, %v3031_v50  ;;  %3032 = vst [vmem:[#allocation53_spill] sm:$0xff] %v1994_v51  ;;  %418 = vmatpush1.msra.mxu1 %v417_v12  ;;  %v429_v56 = vand.u32 4294901760, %v428_v28  ;;  %v2010_v30 = vld [vmem:[#allocation7 + $0x1a0] sm:$0xff]  ;;  %197 = vmatpush2.msra.mxu0 %v1994_v51  ;;  %v2851_v12 = vand.u32 4294901760, %v1998_v21 }
  0x52   :  { %v440_v26 = vsub.f32 %v1964_v13, %v3034_v53  ;;  %3035 = vst [vmem:[#allocation55_spill] sm:$0xff] %v2008_v41  ;;  %v2016_v28 = vsub.f32 %v1862_v36, %v1894_v43  ;;  %v2019_v53 = vand.u32 4294901760, %v1987_v33  ;;  %v3038_v13 = vand.u32 4294901760, %v1985_v46  ;;  %199 = vmatprep.subr.mxu0 %v2008_v41 }
  0x53   :  { %424 = vmatprep.subr.mxu1 %v423_v38  ;;  %v435_v44 = vand.u32 4294901760, %v434_v34  ;;  %v2029_v34 = vsub.f32 %v1873_v37, %v1905_v62  ;;  %v2032_v36 = vand.u32 4294901760, %v2000_v19  ;;  %v452_v43 = vsub.f32 %v1998_v21, %v2851_v12  ;;  %v2046_v37 = vld [vmem:[#allocation7 + $0x190] sm:$0xff] }
  0x54   :  { %3036 = vst [vmem:[#allocation56_spill] sm:$0xff] %v2016_v28  ;;  %3037 = vst [vmem:[#allocation57_spill] sm:$0xff] %v2019_v53  ;;  %430 = vmatpush1.msra.mxu1 %v429_v56  ;;  %v441_v50 = vand.u32 4294901760, %v440_v26  ;;  %v446_v38 = vsub.f32 %v1985_v46, %v3038_v13  ;;  %201 = vmatpush2.msra.mxu0 %v2019_v53  ;;  %v2041_v13 = vsub.f32 %v1886_v29, %v1918_v47  ;;  %v2057_v29 = vld [vmem:[#allocation7 + $0x188] sm:$0xff] }
  0x55   :  { %3039 = vst [vmem:[#allocation58_spill] sm:$0xff] %v2029_v34  ;;  %3040 = vst [vmem:[#allocation59_spill] sm:$0xff] %v2032_v36  ;;  %436 = vmatprep.subr.mxu1 %v435_v44  ;;  %v2044_v26 = vand.u32 4294901760, %v2010_v30  ;;  %v2862_v44 = vand.u32 4294901760, %v2029_v34  ;;  %203 = vmatprep.subr.mxu0 %v2032_v36  ;;  %v2052_v12 = vsub.f32 %v1896_v1, %v1930_v61  ;;  %v2055_v56 = vand.u32 4294901760, %v2021_v24 }
  0x56   :  { %3041 = vst [vmem:[#allocation60_spill] sm:$0xff] %v2041_v13  ;;  %442 = vmatpush1.msra.mxu1 %v441_v50  ;;  %v447_v62 = vand.u32 4294901760, %v446_v38  ;;  %v453_v47 = vand.u32 4294901760, %v452_v43  ;;  %v3045_v21 = vand.u32 4294901760, %v2016_v28  ;;  %v2066_v38 = vsub.f32 %v1907_v52, %v1941_v2  ;;  %v2080_v50 = vld [vmem:[#allocation7 + $0x180] sm:$0xff] }
  0x57   :  { %3042 = vst [vmem:[#allocation61_spill] sm:$0xff] %v2044_v26  ;;  %3043 = vst [vmem:[#allocation62_spill] sm:$0xff] %v2052_v12  ;;  %205 = vmatpush2.msra.mxu0 %v2044_v26  ;;  %v464_v1 = vsub.f32 %v2029_v34, %v2862_v44  ;;  %v2074_v43 = vand.u32 4294901760, %v2046_v37  ;;  %v2087_v61 = vand.u32 4294901760, %v2057_v29  ;;  %v2089_v34 = vld [vmem:[#allocation7 + $0x178] sm:$0xff]  ;;  %v3051_v27 = vand.u32 4294901760, %v2052_v12 }
  0x58   :  { %3044 = vst [vmem:[#allocation63_spill] sm:$0xff] %v2055_v56  ;;  %v458_v46 = vsub.f32 %v2016_v28, %v3045_v21  ;;  %3046 = vst [vmem:[#allocation64_spill] sm:$0xff] %v2066_v38  ;;  %448 = vmatprep.subr.mxu1 %v447_v62  ;;  %207 = vmatprep.subr.mxu0 %v2055_v56  ;;  %v2078_v21 = vsub.f32 %v1932_v49, %v1960_v14  ;;  %v3049_v62 = vand.u32 4294901760, %v2041_v13 }
  0x59   :  { %3047 = vst [vmem:[#allocation65_spill] sm:$0xff] %v2074_v43  ;;  %454 = vmatpush1.msra.mxu1 %v453_v47  ;;  %3050 = vst [vmem:[#allocation67_spill] sm:$0xff] %v2087_v61  ;;  %v465_v28 = vand.u32 4294901760, %v464_v1  ;;  %v476_v49 = vsub.f32 %v2052_v12, %v3051_v27  ;;  %209 = vmatpush2.msra.mxu0 %v2074_v43  ;;  %v3053_v14 = vand.u32 4294901760, %v2066_v38  ;;  %v2107_v27 = vand.u32 4294901760, %v2080_v50  ;;  %v2113_v12 = vld [vmem:[#allocation7 + $0x168] sm:$0xff] }
  0x5a   :  { %3048 = vst [vmem:[#allocation66_spill] sm:$0xff] %v2078_v21  ;;  %v459_v52 = vand.u32 4294901760, %v458_v46  ;;  %v470_v2 = vsub.f32 %v2041_v13, %v3049_v62  ;;  %v2098_v46 = vsub.f32 %v1943_v39, %v1974_v20  ;;  %v2100_v62 = vld [vmem:[#allocation7 + $0x170] sm:$0xff]  ;;  %211 = vmatprep.subr.mxu0 %v2087_v61  ;;  %v2111_v47 = vsub.f32 %v1966_v7, %v1994_v51 }
  0x5b   :  { %v482_v1 = vsub.f32 %v2066_v38, %v3053_v14  ;;  %3054 = vst [vmem:[#allocation69_spill] sm:$0xff] %v2107_v27  ;;  %v477_v39 = vand.u32 4294901760, %v476_v49  ;;  %v2120_v14 = vand.u32 4294901760, %v2089_v34  ;;  %v2122_v38 = vld [vmem:[#allocation7 + $0x160] sm:$0xff]  ;;  %213 = vmatpush2.msra.mxu0 %v2107_v27  ;;  %v2131_v49 = vand.u32 4294901760, %v2100_v62 }
  0x5c   :  { %3052 = vst [vmem:[#allocation68_spill] sm:$0xff] %v2098_v46  ;;  %460 = vmatprep.subr.mxu1 %v459_v52  ;;  %v471_v44 = vand.u32 4294901760, %v470_v2  ;;  %3055 = vst [vmem:[#allocation70_spill] sm:$0xff] %v2111_v47  ;;  %v3056_v52 = vand.u32 4294901760, %v2078_v21  ;;  %v2885_v7 = vand.u32 4294901760, %v2111_v47  ;;  %v3060_v51 = vand.u32 4294901760, %v2098_v46 }
  0x5d   :  { %466 = vmatpush2.msra.mxu1 %v465_v28  ;;  %3057 = vst [vmem:[#allocation71_spill] sm:$0xff] %v2120_v14  ;;  %v483_v13 = vand.u32 4294901760, %v482_v1  ;;  %v2128_v28 = vsub.f32 %v1976_v32, %v2008_v41  ;;  %3059 = vst [vmem:[#allocation73_spill] sm:$0xff] %v2131_v49  ;;  %215 = vmatprep.subr.mxu0 %v2120_v14  ;;  %v2141_v1 = vsub.f32 %v1987_v33, %v2019_v53  ;;  %v2158_v33 = vld [vmem:[#allocation7 + $0x150] sm:$0xff] }
  0x5e   :  { %v488_v2 = vsub.f32 %v2078_v21, %v3056_v52  ;;  %472 = vmatprep.subr.mxu1 %v471_v44  ;;  %v2133_v52 = vld [vmem:[#allocation7 + $0x158] sm:$0xff]  ;;  %v494_v44 = vsub.f32 %v2098_v46, %v3060_v51  ;;  %v2144_v32 = vand.u32 4294901760, %v2113_v12  ;;  %v500_v41 = vsub.f32 %v2111_v47, %v2885_v7  ;;  %217 = vmatpush2.msra.mxu0 %v2131_v49 }
  0x5f   :  { %3058 = vst [vmem:[#allocation72_spill] sm:$0xff] %v2128_v28  ;;  %478 = vmatpush2.msra.mxu1 %v477_v39  ;;  %3061 = vst [vmem:[#allocation74_spill] sm:$0xff] %v2141_v1  ;;  %v2153_v51 = vsub.f32 %v2000_v19, %v2032_v36  ;;  %v2164_v7 = vsub.f32 %v2010_v30, %v2044_v26  ;;  %v2167_v39 = vand.u32 4294901760, %v2133_v52  ;;  %v2169_v19 = vld [vmem:[#allocation7 + $0x148] sm:$0xff]  ;;  %v3067_v47 = vand.u32 4294901760, %v2128_v28 }
  0x60   :  { %v489_v20 = vand.u32 4294901760, %v488_v2  ;;  %3062 = vst [vmem:[#allocation75_spill] sm:$0xff] %v2144_v32  ;;  %484 = vmatprep.subr.mxu1 %v483_v13  ;;  %v2156_v2 = vand.u32 4294901760, %v2122_v38  ;;  %v495_v53 = vand.u32 4294901760, %v494_v44  ;;  %v2896_v13 = vand.u32 4294901760, %v2141_v1  ;;  %219 = vmatprep.subr.mxu0 %v2144_v32 }
  0x61   :  { %3063 = vst [vmem:[#allocation76_spill] sm:$0xff] %v2153_v51  ;;  %3065 = vst [vmem:[#allocation78_spill] sm:$0xff] %v2164_v7  ;;  %v501_v36 = vand.u32 4294901760, %v500_v41  ;;  %v506_v46 = vsub.f32 %v2128_v28, %v3067_v47  ;;  %v2178_v44 = vsub.f32 %v2021_v24, %v2055_v56  ;;  %v2186_v41 = vand.u32 4294901760, %v2158_v33 }
  0x62   :  { %3064 = vst [vmem:[#allocation77_spill] sm:$0xff] %v2156_v2  ;;  %490 = vmatpush2.msra.mxu1 %v489_v20  ;;  %3066 = vst [vmem:[#allocation79_spill] sm:$0xff] %v2167_v39  ;;  %221 = vmatpush2.msra.mxu0 %v2156_v2  ;;  %v512_v30 = vsub.f32 %v2141_v1, %v2896_v13  ;;  %v2190_v47 = vsub.f32 %v2046_v37, %v2074_v43  ;;  %v2192_v20 = vld [vmem:[#allocation7 + $0x140] sm:$0xff]  ;;  %v2199_v26 = vand.u32 4294901760, %v2169_v19  ;;  %v2201_v1 = vld [vmem:[#allocation7 + $0x138] sm:$0xff] }
  0x63   :  { %3068 = vst [vmem:[#allocation80_spill] sm:$0xff] %v2178_v44  ;;  %496 = vmatprep.subr.mxu1 %v495_v53  ;;  %223 = vmatprep.subr.mxu0 %v2167_v39  ;;  %3069 = vst [vmem:[#allocation81_spill] sm:$0xff] %v2186_v41  ;;  %v507_v24 = vand.u32 4294901760, %v506_v46  ;;  %v3071_v53 = vand.u32 4294901760, %v2153_v51  ;;  %v3073_v21 = vand.u32 4294901760, %v2164_v7  ;;  %v2210_v46 = vsub.f32 %v2057_v29, %v2087_v61 }
  0x64   :  { %3070 = vst [vmem:[#allocation82_spill] sm:$0xff] %v2190_v47  ;;  %502 = vmatpush2.msra.mxu1 %v501_v36  ;;  %3072 = vst [vmem:[#allocation83_spill] sm:$0xff] %v2199_v26  ;;  %v513_v28 = vand.u32 4294901760, %v512_v30  ;;  %225 = vmatpush2.msra.mxu0 %v2186_v41  ;;  %v3075_v43 = vand.u32 4294901760, %v2178_v44  ;;  %v2223_v36 = vsub.f32 %v2080_v50, %v2107_v27 }
  0x65   :  { %v518_v56 = vsub.f32 %v2153_v51, %v3071_v53  ;;  %v524_v37 = vsub.f32 %v2164_v7, %v3073_v21  ;;  %3074 = vst [vmem:[#allocation84_spill] sm:$0xff] %v2210_v46  ;;  %v2212_v53 = vld [vmem:[#allocation7 + $0x130] sm:$0xff]  ;;  %508 = vmatprep.subr.mxu1 %v507_v24  ;;  %227 = vmatprep.subr.mxu0 %v2199_v26  ;;  %v2219_v21 = vand.u32 4294901760, %v2192_v20  ;;  %v2225_v7 = vld [vmem:[#allocation7 + $0x128] sm:$0xff]  ;;  %v3078_v24 = vand.u32 4294901760, %v2190_v47 }
  0x66   :  { %v530_v30 = vsub.f32 %v2178_v44, %v3075_v43  ;;  %3077 = vst [vmem:[#allocation86_spill] sm:$0xff] %v2223_v36  ;;  %514 = vmatpush2.msra.mxu1 %v513_v28  ;;  %v2232_v43 = vand.u32 4294901760, %v2201_v1  ;;  %v2234_v44 = vld [vmem:[#allocation7 + $0x120] sm:$0xff]  ;;  %v2919_v50 = vand.u32 4294901760, %v2223_v36  ;;  %v2240_v28 = vsub.f32 %v2089_v34, %v2120_v14 }
  0x67   :  { %v519_v13 = vand.u32 4294901760, %v518_v56  ;;  %3076 = vst [vmem:[#allocation85_spill] sm:$0xff] %v2219_v21  ;;  %v525_v29 = vand.u32 4294901760, %v524_v37  ;;  %v536_v56 = vsub.f32 %v2190_v47, %v3078_v24  ;;  %229 = vmatpush2.msra.mxu0 %v2219_v21  ;;  %v2243_v37 = vand.u32 4294901760, %v2212_v53  ;;  %v2245_v24 = vld [vmem:[#allocation7 + $0x118] sm:$0xff] }
  0x68   :  { %v531_v51 = vand.u32 4294901760, %v530_v30  ;;  %3079 = vst [vmem:[#allocation87_spill] sm:$0xff] %v2240_v28  ;;  %v3080_v27 = vand.u32 4294901760, %v2210_v46  ;;  %231 = vmatprep.subr.mxu0 %v2232_v43  ;;  %v2253_v30 = vsub.f32 %v2100_v62, %v2131_v49  ;;  %v2256_v34 = vand.u32 4294901760, %v2225_v7  ;;  %v2270_v62 = vld [vmem:[#allocation7 + $0x110] sm:$0xff] }
  0x69   :  { %520 = vmatprep.subr.mxu1 %v519_v13  ;;  %v537_v61 = vand.u32 4294901760, %v536_v56  ;;  %v548_v14 = vsub.f32 %v2223_v36, %v2919_v50  ;;  %233 = vmatpush2.msra.mxu0 %v2243_v37  ;;  %v2268_v56 = vand.u32 4294901760, %v2234_v44  ;;  %v2276_v50 = vsub.f32 %v2122_v38, %v2156_v2 }
  0x6a   :  { %526 = vmatpush2.msra.mxu1 %v525_v29  ;;  %v542_v13 = vsub.f32 %v2210_v46, %v3080_v27  ;;  %3081 = vst [vmem:[#allocation88_spill] sm:$0xff] %v2253_v30  ;;  %3082 = vst [vmem:[#allocation89_spill] sm:$0xff] %v2256_v34  ;;  %v2265_v27 = vsub.f32 %v2113_v12, %v2144_v32  ;;  %235 = vmatprep.subr.mxu0 %v2256_v34  ;;  %v2279_v29 = vand.u32 4294901760, %v2245_v24  ;;  %v2281_v12 = vld [vmem:[#allocation7 + $0x108] sm:$0xff] }
  0x6b   :  { %532 = vmatprep.subr.mxu1 %v531_v51  ;;  %3084 = vst [vmem:[#allocation91_spill] sm:$0xff] %v2268_v56  ;;  %v2930_v51 = vand.u32 4294901760, %v2253_v30  ;;  %3085 = vst [vmem:[#allocation92_spill] sm:$0xff] %v2276_v50  ;;  %v549_v32 = vand.u32 4294901760, %v548_v14  ;;  %v3087_v36 = vand.u32 4294901760, %v2240_v28  ;;  %237 = vmatpush2.msra.mxu0 %v2268_v56  ;;  %v2298_v14 = vand.u32 4294901760, %v2270_v62 }
  0x6c   :  { %3083 = vst [vmem:[#allocation90_spill] sm:$0xff] %v2265_v27  ;;  %538 = vmatpush2.msra.mxu1 %v537_v61  ;;  %v543_v49 = vand.u32 4294901760, %v542_v13  ;;  %3086 = vst [vmem:[#allocation93_spill] sm:$0xff] %v2279_v29  ;;  %v2290_v13 = vsub.f32 %v2133_v52, %v2167_v39  ;;  %239 = vmatprep.subr.mxu0 %v2279_v29  ;;  %v2304_v61 = vld [vmem:[#allocation7 + $0x100] sm:$0xff]  ;;  %v2311_v2 = vand.u32 4294901760, %v2281_v12  ;;  %v3091_v47 = vand.u32 4294901760, %v2276_v50 }
  0x6d   :  { %v554_v46 = vsub.f32 %v2240_v28, %v3087_v36  ;;  %v560_v38 = vsub.f32 %v2253_v30, %v2930_v51  ;;  %v2302_v36 = vsub.f32 %v2158_v33, %v2186_v41  ;;  %v53_v30 = vld [vmem:[#allocation5] sm:$0xff]  ;;  %241 = vmatpush2.msra.mxu0 %v2298_v14 }
  0x6e   :  { %3088 = vst [vmem:[#allocation94_spill] sm:$0xff] %v2290_v13  ;;  %544 = vmatprep.subr.mxu1 %v543_v49  ;;  %v3090_v49 = vand.u32 4294901760, %v2265_v27  ;;  %v572_v33 = vsub.f32 %v2276_v50, %v3091_v47  ;;  %v3093_v41 = vand.u32 4294901760, %v2290_v13  ;;  %243 = vmatprep.subr.mxu0 %v2311_v2  ;;  %v2331_v47 = vsub.f32 %v2192_v20, %v2219_v21 }
  0x6f   :  { %3089 = vst [vmem:[#allocation95_spill] sm:$0xff] %v2302_v36  ;;  %550 = vmatpush2.msra.mxu1 %v549_v32  ;;  %v555_v52 = vand.u32 4294901760, %v554_v46  ;;  %v561_v28 = vand.u32 4294901760, %v560_v38  ;;  %v2320_v46 = vsub.f32 %v2169_v19, %v2199_v26  ;;  %v2327_v38 = vand.u32 4294901760, %v2304_v61 }
  0x70   :  { %v566_v39 = vsub.f32 %v2265_v27, %v3090_v49  ;;  %v52_v49 = vld [vmem:[#allocation2] sm:$0xff]  ;;  %v578_v27 = vsub.f32 %v2290_v13, %v3093_v41  ;;  %3094 = vst [vmem:[#allocation97_spill] sm:$0xff] %v2331_v47  ;;  %v573_v32 = vand.u32 4294901760, %v572_v33  ;;  %v3095_v19 = vand.u32 4294901760, %v2302_v36 }
  0x71   :  { %3092 = vst [vmem:[#allocation96_spill] sm:$0xff] %v2320_v46  ;;  %556 = vmatprep.subr.mxu1 %v555_v52  ;;  %v2337_v26 = vand.u32 4294901760, %v53_v30  ;;  %245 = vmatpush2.msra.mxu0 %v2327_v38  ;;  %v2947_v13 = vand.u32 4294901760, %v2331_v47  ;;  %v2343_v20 = vsub.f32 %v2201_v1, %v2232_v43 }
  0x72   :  { %v567_v51 = vand.u32 4294901760, %v566_v39  ;;  %562 = vmatpush2.msra.mxu1 %v561_v28  ;;  %v584_v52 = vsub.f32 %v2302_v36, %v3095_v19  ;;  %v2948_v39 = vand.u32 4294901760, %v2320_v46  ;;  %v579_v41 = vand.u32 4294901760, %v578_v27  ;;  %658 = vmatprep.subr.mxu0 %v1569_v18 }
  0x73   :  { %3096 = vst [vmem:[#allocation98_spill] sm:$0xff] %v2337_v26  ;;  %3097 = vst [vmem:[#allocation99_spill] sm:$0xff] %v2343_v20  ;;  %v2345_v28 = vand.u32 4294901760, %v52_v49  ;;  %v2351_v21 = vsub.f32 %v53_v30, %v2337_v26  ;;  %v2356_v27 = vsub.f32 %v2212_v53, %v2243_v37  ;;  %v596_v1 = vsub.f32 %v2331_v47, %v2947_v13 }
  0x74   :  { %568 = vmatprep.subr.mxu1 %v567_v51  ;;  %v585_v33 = vand.u32 4294901760, %v584_v52  ;;  %v590_v19 = vsub.f32 %v2320_v46, %v2948_v39  ;;  %v2951_v51 = vand.u32 4294901760, %v2343_v20  ;;  %v2367_v30 = vsub.f32 %v2225_v7, %v2256_v34  ;;  %648 = vmatprep.mubr.f32.mxu1 %v2337_v26 }
  0x75   :  { %3098 = vst [vmem:[#allocation100_spill] sm:$0xff] %v2345_v28  ;;  %574 = vmatpush2.msra.mxu1 %v573_v32  ;;  %3099 = vst [vmem:[#allocation101_spill] sm:$0xff] %v2356_v27  ;;  %v2363_v32 = vsub.f32 %v52_v49, %v2345_v28  ;;  %v2952_v53 = vand.u32 4294901760, %v2351_v21  ;;  %v2374_v13 = vsub.f32 %v2234_v44, %v2268_v56  ;;  %v597_v39 = vand.u32 4294901760, %v596_v1 }
  0x76   :  { %580 = vmatprep.subr.mxu1 %v579_v41  ;;  %3100 = vst [vmem:[#allocation102_spill] sm:$0xff] %v2367_v30  ;;  %v591_v52 = vand.u32 4294901760, %v590_v19  ;;  %v2955_v41 = vand.u32 4294901760, %v2356_v27  ;;  %v602_v49 = vsub.f32 %v2343_v20, %v2951_v51  ;;  %v2961_v34 = vand.u32 4294901760, %v2367_v30 }
  0x77   :  { %586 = vmatpush2.msra.mxu1 %v585_v33  ;;  %v2960_v7 = vand.u32 4294901760, %v2363_v32  ;;  %v249_v33 = vsub.f32 %v2351_v21, %v2952_v53  ;;  %v2390_v1 = vsub.f32 %v2245_v24, %v2279_v29  ;;  %v2400_v26 = vsub.f32 %v2270_v62, %v2298_v14 }
  0x78   :  { %592 = vmatprep.subr.mxu1 %v591_v52  ;;  %v608_v19 = vsub.f32 %v2356_v27, %v2955_v41  ;;  %v603_v51 = vand.u32 4294901760, %v602_v49  ;;  %v614_v53 = vsub.f32 %v2367_v30, %v2961_v34  ;;  %v3103_v56 = vand.u32 4294901760, %v2374_v13 }
  0x79   :  { %3101 = vst [vmem:[#allocation103_spill] sm:$0xff] %v2390_v1  ;;  %598 = vmatpush2.msra.mxu1 %v597_v39  ;;  %v255_v52 = vsub.f32 %v2363_v32, %v2960_v7  ;;  %3102 = vst [vmem:[#allocation104_spill] sm:$0xff] %v2400_v26  ;;  %v250_v41 = vand.u32 4294901760, %v249_v33  ;;  %v2965_v39 = vand.u32 4294901760, %v2390_v1  ;;  %v2964_v7 = vand.u32 4294901760, %v2400_v26 }
  0x7a   :  { %v609_v44 = vand.u32 4294901760, %v608_v19  ;;  %v620_v24 = vsub.f32 %v2374_v13, %v3103_v56  ;;  %604 = vmatprep.subr.mxu1 %v603_v51  ;;  %v615_v29 = vand.u32 4294901760, %v614_v53  ;;  %v2409_v34 = vsub.f32 %v2281_v12, %v2311_v2 }
  0x7b   :  { %v256_v49 = vand.u32 4294901760, %v255_v52  ;;  %251 = vmatprep.mubr.f32.mxu0 %v250_v41  ;;  %v626_v33 = vsub.f32 %v2390_v1, %v2965_v39  ;;  %v2416_v56 = vsub.f32 %v2304_v61, %v2327_v38  ;;  %v632_v51 = vsub.f32 %v2400_v26, %v2964_v7  ;;  %v3119_v7 = vld [vmem:[#allocation42_spill] sm:$0xff]  ;;  %v3120_v39 = vld [vmem:[#allocation19_spill] sm:$0xff] }
  0x7c   :  { %3104 = vst [vmem:[#allocation105_spill] sm:$0xff] %v2409_v34  ;;  %610 = vmatpush2.msra.mxu1 %v609_v44  ;;  %v621_v62 = vand.u32 4294901760, %v620_v24  ;;  %v2963_v12 = vand.u32 4294901760, %v2409_v34  ;;  %v3106_v24 = vld [vmem:[#allocation12_spill] sm:$0xff] }
  0x7d   :  { %3105 = vst [vmem:[#allocation106_spill] sm:$0xff] %v2416_v56  ;;  %257 = vmatmul.mubr.f32.vlgmr.msra.gmra.mxu0 %v256_v49  ;;  %616 = vmatprep.subr.mxu1 %v615_v29  ;;  %v627_v53 = vand.u32 4294901760, %v626_v33  ;;  %v2962_v41 = vand.u32 4294901760, %v2416_v56  ;;  %v633_v19 = vand.u32 4294901760, %v632_v51  ;;  %v3107_v49 = vld [vmem:[#allocation30_spill] sm:$0xff]  ;;  %v3109_v33 = vld [vmem:[#allocation32_spill] sm:$0xff] }
  0x7e   :  { %661 = vmatpush1.msra.mxu0 %v1582_v23  ;;  %622 = vmatpush2.msra.mxu1 %v621_v62  ;;  %v638_v61 = vsub.f32 %v2409_v34, %v2963_v12  ;;  %v3108_v62 = vld [vmem:[#allocation13_spill] sm:$0xff]  ;;  %v3110_v51 = vld [vmem:[#allocation14_spill] sm:$0xff] }
  0x7f   :  { %664 = vmatprep.subr.mxu0 %v1588_v25  ;;  %850 = vmatprep.mubr.f32.mxu0 %v2351_v21  ;;  %v644_v29 = vsub.f32 %v2416_v56, %v2962_v41  ;;  %v3117_v41 = vld [vmem:[#allocation40_spill] sm:$0xff]  ;;  %v3118_v12 = vld [vmem:[#allocation18_spill] sm:$0xff] }
  0x80   :  { %667 = vmatpush1.msra.mxu0 %v1602_v31  ;;  %628 = vmatprep.subr.mxu1 %v627_v53  ;;  %v639_v44 = vand.u32 4294901760, %v638_v61  ;;  %v3111_v53 = vld [vmem:[#allocation34_spill] sm:$0xff]  ;;  %v3113_v61 = vld [vmem:[#allocation36_spill] sm:$0xff] }
  0x81   :  { %670 = vmatprep.subr.mxu0 %v1611_v35  ;;  %634 = vmatpush2.msra.mxu1 %v633_v19  ;;  %v645_v52 = vand.u32 4294901760, %v644_v29  ;;  %v3112_v19 = vld [vmem:[#allocation15_spill] sm:$0xff]  ;;  %v3114_v29 = vld [vmem:[#allocation16_spill] sm:$0xff] }
  0x82   :  { %673 = vmatpush1.msra.mxu0 %v1624_v40  ;;  %640 = vmatprep.subr.mxu1 %v639_v44  ;;  %v3115_v44 = vld [vmem:[#allocation38_spill] sm:$0xff] }
  0x83   :  { %676 = vmatprep.subr.mxu0 %v1638_v45  ;;  %646 = vmatpush2.msra.mxu1 %v645_v52  ;;  %v3116_v52 = vld [vmem:[#allocation17_spill] sm:$0xff] }
  0x84   :  { %679 = vmatpush1.msra.mxu0 %v1664_v59  ;;  %650 = vmatmul.mubr.f32.vlgmr.msra.gmra.mxu1 %v2345_v28  ;;  %v3121_v28 = vld [vmem:[#allocation44_spill] sm:$0xff] }
  0x85   :  { %682 = vmatprep.subr.mxu0 %v1676_v0  ;;  %860 = vmatprep.subr.mxu1 %v1549_v3 }
  0x86   :  { %685 = vmatpush1.msra.mxu0 %v1687_v8  ;;  %862 = vmatpush1.msra.mxu1 %v1551_v4 }
  0x87   :  { %688 = vmatprep.subr.mxu0 %v1698_v42  ;;  %864 = vmatprep.subr.mxu1 %v1553_v5 }
  0x88   :  { %691 = vmatpush1.msra.mxu0 %v1710_v48  ;;  %866 = vmatpush1.msra.mxu1 %v1555_v9 }
  0x89   :  { %694 = vmatprep.subr.mxu0 %v1724_v57  ;;  %868 = vmatprep.subr.mxu1 %v1557_v10 }
  0x8a   :  { %697 = vmatpush1.msra.mxu0 %v1736_v6  ;;  %870 = vmatpush1.msra.mxu1 %v1559_v11 }
  0x8b   :  { %700 = vmatprep.subr.mxu0 %v1757_v54  ;;  %872 = vmatprep.subr.mxu1 %v1562_v15 }
  0x8c   :  { %703 = vmatpush1.msra.mxu0 %v1770_v63  ;;  %874 = vmatpush1.msra.mxu1 %v1564_v16 }
  0x8d   :  { %706 = vmatprep.subr.mxu0 %v1788_v55  ;;  %876 = vmatprep.subr.mxu1 %v1566_v17 }
  0x8e   :  { %709 = vmatpush1.msra.mxu0 %v1801_v58  ;;  %878 = vmatpush1.msra.mxu1 %v1579_v22 }
  0x8f   :  { %712 = vmatprep.subr.mxu0 %v1813_v60  ;;  %880 = vmatprep.subr.mxu1 %v3106_v24 }
  0x90   :  { %715 = vmatpush1.msra.mxu0 %v3107_v49  ;;  %882 = vmatpush1.msra.mxu1 %v3108_v62 }
  0x91   :  { %718 = vmatprep.subr.mxu0 %v3109_v33  ;;  %884 = vmatprep.subr.mxu1 %v3110_v51 }
  0x92   :  { %721 = vmatpush1.msra.mxu0 %v3111_v53  ;;  %886 = vmatpush1.msra.mxu1 %v3112_v19  ;;  %v3122_v53 = vld [vmem:[#allocation20_spill] sm:$0xff]  ;;  %v3123_v19 = vld [vmem:[#allocation46_spill] sm:$0xff] }
  0x93   :  { %724 = vmatprep.subr.mxu0 %v3113_v61  ;;  %888 = vmatprep.subr.mxu1 %v3114_v29  ;;  %v3124_v61 = vld [vmem:[#allocation21_spill] sm:$0xff]  ;;  %v3125_v29 = vld [vmem:[#allocation48_spill] sm:$0xff] }
  0x94   :  { %727 = vmatpush1.msra.mxu0 %v3115_v44  ;;  %890 = vmatpush1.msra.mxu1 %v3116_v52  ;;  %v3126_v44 = vld [vmem:[#allocation22_spill] sm:$0xff] }
  0x95   :  { %730 = vmatprep.subr.mxu0 %v3117_v41  ;;  %892 = vmatprep.subr.mxu1 %v3118_v12  ;;  %v3127_v52 = vld [vmem:[#allocation50_spill] sm:$0xff]  ;;  %v3128_v41 = vld [vmem:[#allocation23_spill] sm:$0xff]  ;;  %v3129_v12 = vld [vmem:[#allocation52_spill] sm:$0xff] }
  0x96   :  { %733 = vmatpush1.msra.mxu0 %v3119_v7  ;;  %894 = vmatpush1.msra.mxu1 %v3120_v39  ;;  %v3130_v7 = vld [vmem:[#allocation24_spill] sm:$0xff]  ;;  %v3131_v39 = vld [vmem:[#allocation54_spill] sm:$0xff] }
  0x97   :  { %736 = vmatprep.subr.mxu0 %v3121_v28  ;;  %896 = vmatprep.subr.mxu1 %v3122_v53  ;;  %v3132_v28 = vld [vmem:[#allocation25_spill] sm:$0xff]  ;;  %v3133_v53 = vld [vmem:[#allocation56_spill] sm:$0xff] }
  0x98   :  { %739 = vmatpush1.msra.mxu0 %v3123_v19  ;;  %898 = vmatpush1.msra.mxu1 %v3124_v61  ;;  %v3134_v19 = vld [vmem:[#allocation26_spill] sm:$0xff] }
  0x99   :  { %742 = vmatprep.subr.mxu0 %v3125_v29  ;;  %900 = vmatprep.subr.mxu1 %v3126_v44  ;;  %v3135_v61 = vld [vmem:[#allocation58_spill] sm:$0xff]  ;;  %v3136_v29 = vld [vmem:[#allocation27_spill] sm:$0xff]  ;;  %v3137_v44 = vld [vmem:[#allocation60_spill] sm:$0xff] }
  0x9a   :  { %745 = vmatpush1.msra.mxu0 %v3127_v52  ;;  %902 = vmatpush1.msra.mxu1 %v3128_v41  ;;  %v3138_v52 = vld [vmem:[#allocation28_spill] sm:$0xff]  ;;  %v3139_v41 = vld [vmem:[#allocation62_spill] sm:$0xff] }
  0x9b   :  { %748 = vmatprep.subr.mxu0 %v3129_v12  ;;  %904 = vmatprep.subr.mxu1 %v3130_v7  ;;  %v3140_v12 = vld [vmem:[#allocation29_spill] sm:$0xff]  ;;  %v3141_v7 = vld [vmem:[#allocation64_spill] sm:$0xff] }
  0x9c   :  { %751 = vmatpush1.msra.mxu0 %v3131_v39  ;;  %906 = vmatpush1.msra.mxu1 %v3132_v28  ;;  %v3142_v39 = vld [vmem:[#allocation31_spill] sm:$0xff]  ;;  %v3143_v28 = vld [vmem:[#allocation66_spill] sm:$0xff] }
  0x9d   :  { %754 = vmatprep.subr.mxu0 %v3133_v53  ;;  %908 = vmatprep.subr.mxu1 %v3134_v19  ;;  %v3144_v53 = vld [vmem:[#allocation33_spill] sm:$0xff]  ;;  %v3145_v19 = vld [vmem:[#allocation68_spill] sm:$0xff] }
  0x9e   :  { %757 = vmatpush2.msra.mxu0 %v3135_v61  ;;  %910 = vmatpush1.msra.mxu1 %v3136_v29  ;;  %v3146_v61 = vld [vmem:[#allocation35_spill] sm:$0xff]  ;;  %v3147_v29 = vld [vmem:[#allocation70_spill] sm:$0xff] }
  0x9f   :  { %760 = vmatprep.subr.mxu0 %v3137_v44  ;;  %912 = vmatprep.subr.mxu1 %v3138_v52  ;;  %v3148_v44 = vld [vmem:[#allocation37_spill] sm:$0xff]  ;;  %v3149_v52 = vld [vmem:[#allocation72_spill] sm:$0xff] }
  0xa0   :  { %763 = vmatpush2.msra.mxu0 %v3139_v41  ;;  %914 = vmatpush1.msra.mxu1 %v3140_v12  ;;  %v3150_v41 = vld [vmem:[#allocation39_spill] sm:$0xff]  ;;  %v3151_v12 = vld [vmem:[#allocation74_spill] sm:$0xff] }
  0xa1   :  { %766 = vmatprep.subr.mxu0 %v3141_v7  ;;  %916 = vmatprep.subr.mxu1 %v3142_v39  ;;  %v3152_v7 = vld [vmem:[#allocation41_spill] sm:$0xff]  ;;  %v3153_v39 = vld [vmem:[#allocation76_spill] sm:$0xff] }
  0xa2   :  { %769 = vmatpush2.msra.mxu0 %v3143_v28  ;;  %918 = vmatpush1.msra.mxu1 %v3144_v53  ;;  %v3154_v28 = vld [vmem:[#allocation43_spill] sm:$0xff]  ;;  %v3155_v53 = vld [vmem:[#allocation78_spill] sm:$0xff] }
  0xa3   :  { %772 = vmatprep.subr.mxu0 %v3145_v19  ;;  %920 = vmatprep.subr.mxu1 %v3146_v61  ;;  %v3156_v19 = vld [vmem:[#allocation45_spill] sm:$0xff]  ;;  %v3157_v61 = vld [vmem:[#allocation80_spill] sm:$0xff] }
  0xa4   :  { %775 = vmatpush2.msra.mxu0 %v3147_v29  ;;  %922 = vmatpush1.msra.mxu1 %v3148_v44  ;;  %v3158_v29 = vld [vmem:[#allocation47_spill] sm:$0xff]  ;;  %v3159_v44 = vld [vmem:[#allocation82_spill] sm:$0xff] }
  0xa5   :  { %778 = vmatprep.subr.mxu0 %v3149_v52  ;;  %924 = vmatprep.subr.mxu1 %v3150_v41  ;;  %v3160_v52 = vld [vmem:[#allocation49_spill] sm:$0xff]  ;;  %v3161_v41 = vld [vmem:[#allocation84_spill] sm:$0xff] }
  0xa6   :  { %781 = vmatpush2.msra.mxu0 %v3151_v12  ;;  %926 = vmatpush2.msra.mxu1 %v3152_v7  ;;  %v3162_v12 = vld [vmem:[#allocation51_spill] sm:$0xff]  ;;  %v3163_v7 = vld [vmem:[#allocation86_spill] sm:$0xff] }
  0xa7   :  { %784 = vmatprep.subr.mxu0 %v3153_v39  ;;  %928 = vmatprep.subr.mxu1 %v3154_v28  ;;  %v3164_v39 = vld [vmem:[#allocation53_spill] sm:$0xff]  ;;  %v3165_v28 = vld [vmem:[#allocation87_spill] sm:$0xff] }
  0xa8   :  { %787 = vmatpush2.msra.mxu0 %v3155_v53  ;;  %930 = vmatpush2.msra.mxu1 %v3156_v19  ;;  %v3166_v53 = vld [vmem:[#allocation55_spill] sm:$0xff]  ;;  %v3167_v19 = vld [vmem:[#allocation88_spill] sm:$0xff] }
  0xa9   :  { %790 = vmatprep.subr.mxu0 %v3157_v61  ;;  %932 = vmatprep.subr.mxu1 %v3158_v29  ;;  %v3168_v61 = vld [vmem:[#allocation57_spill] sm:$0xff]  ;;  %v3169_v29 = vld [vmem:[#allocation90_spill] sm:$0xff] }
  0xaa   :  { %793 = vmatpush2.msra.mxu0 %v3159_v44  ;;  %934 = vmatpush2.msra.mxu1 %v3160_v52  ;;  %v3170_v44 = vld [vmem:[#allocation59_spill] sm:$0xff] }
  0xab   :  { %796 = vmatprep.subr.mxu0 %v3161_v41  ;;  %936 = vmatprep.subr.mxu1 %v3162_v12  ;;  %v3171_v41 = vld [vmem:[#allocation61_spill] sm:$0xff]  ;;  %v3172_v12 = vld [vmem:[#allocation94_spill] sm:$0xff] }
  0xac   :  { %799 = vmatpush2.msra.mxu0 %v3163_v7  ;;  %938 = vmatpush2.msra.mxu1 %v3164_v39  ;;  %v3173_v7 = vld [vmem:[#allocation63_spill] sm:$0xff] }
  0xad   :  { %802 = vmatprep.subr.mxu0 %v3165_v28  ;;  %940 = vmatprep.subr.mxu1 %v3166_v53  ;;  %v3174_v28 = vld [vmem:[#allocation65_spill] sm:$0xff] }
  0xae   :  { %805 = vmatpush2.msra.mxu0 %v3167_v19  ;;  %942 = vmatpush2.msra.mxu1 %v3168_v61  ;;  %v3175_v19 = vld [vmem:[#allocation67_spill] sm:$0xff] }
  0xaf   :  { %808 = vmatprep.subr.mxu0 %v3169_v29  ;;  %944 = vmatprep.subr.mxu1 %v3170_v44  ;;  %v3176_v29 = vld [vmem:[#allocation69_spill] sm:$0xff] }
  0xb0   :  { %811 = vmatpush2.msra.mxu0 %v2276_v50  ;;  %946 = vmatpush2.msra.mxu1 %v3171_v41  ;;  %v3177_v50 = vld [vmem:[#allocation71_spill] sm:$0xff] }
  0xb1   :  { %814 = vmatprep.subr.mxu0 %v3172_v12  ;;  %948 = vmatprep.subr.mxu1 %v3173_v7  ;;  %v3178_v12 = vld [vmem:[#allocation73_spill] sm:$0xff] }
  0xb2   :  { %817 = vmatpush2.msra.mxu0 %v2302_v36  ;;  %950 = vmatpush2.msra.mxu1 %v3174_v28  ;;  %v3179_v36 = vld [vmem:[#allocation75_spill] sm:$0xff] }
  0xb3   :  { %820 = vmatprep.subr.mxu0 %v2320_v46  ;;  %952 = vmatprep.subr.mxu1 %v3175_v19  ;;  %v3180_v46 = vld [vmem:[#allocation77_spill] sm:$0xff] }
  0xb4   :  { %823 = vmatpush2.msra.mxu0 %v2331_v47  ;;  %954 = vmatpush2.msra.mxu1 %v3176_v29  ;;  %v3181_v47 = vld [vmem:[#allocation79_spill] sm:$0xff] }
  0xb5   :  { %826 = vmatprep.subr.mxu0 %v2343_v20  ;;  %956 = vmatprep.subr.mxu1 %v3177_v50  ;;  %v3182_v20 = vld [vmem:[#allocation81_spill] sm:$0xff] }
  0xb6   :  { %829 = vmatpush2.msra.mxu0 %v2356_v27  ;;  %958 = vmatpush2.msra.mxu1 %v3178_v12  ;;  %v3183_v27 = vld [vmem:[#allocation83_spill] sm:$0xff] }
  0xb7   :  { %832 = vmatprep.subr.mxu0 %v2367_v30  ;;  %960 = vmatprep.subr.mxu1 %v3179_v36  ;;  %v3184_v30 = vld [vmem:[#allocation85_spill] sm:$0xff] }
  0xb8   :  { %835 = vmatpush2.msra.mxu0 %v2374_v13  ;;  %962 = vmatpush2.msra.mxu1 %v3180_v46 }
  0xb9   :  { %838 = vmatprep.subr.mxu0 %v2390_v1  ;;  %964 = vmatprep.subr.mxu1 %v3181_v47  ;;  %v3185_v1 = vand.u32 4294901760, %v1569_v18  ;;  %v3192_v18 = vand.u32 4294901760, %v1611_v35  ;;  %v3197_v35 = vand.u32 4294901760, %v2363_v32 }
  0xba   :  { %841 = vmatpush2.msra.mxu0 %v2400_v26  ;;  %966 = vmatpush2.msra.mxu1 %v3182_v20  ;;  %v3186_v26 = vand.u32 4294901760, %v1582_v23  ;;  %v3187_v20 = vld [vmem:[#allocation89_spill] sm:$0xff]  ;;  %v3193_v23 = vand.u32 4294901760, %v1624_v40  ;;  %v3199_v40 = vand.u32 4294901760, %v1687_v8 }
  0xbb   :  { %844 = vmatprep.subr.mxu0 %v2409_v34  ;;  %968 = vmatprep.subr.mxu1 %v3183_v27  ;;  %v3188_v27 = vand.u32 4294901760, %v1588_v25  ;;  %v3191_v34 = vld [vmem:[#allocation93_spill] sm:$0xff]  ;;  %v3194_v25 = vand.u32 4294901760, %v1638_v45  ;;  %v3200_v45 = vand.u32 4294901760, %v1698_v42  ;;  %v3213_v42 = vld [vmem:[#allocation15_spill] sm:$0xff] }
  0xbc   :  { %847 = vmatpush2.msra.mxu0 %v2416_v56  ;;  %970 = vmatpush2.msra.mxu1 %v3184_v30  ;;  %v3189_v56 = vld [vmem:[#allocation91_spill] sm:$0xff]  ;;  %v3190_v30 = vand.u32 4294901760, %v1602_v31  ;;  %v3195_v31 = vand.u32 4294901760, %v2351_v21  ;;  %v3223_v21 = vld [vmem:[#allocation42_spill] sm:$0xff] }
  0xbd   :  { %853 = vmatmul.mubr.f32.vlgmr.msra.gmra.mxu0 %v2363_v32  ;;  %972 = vmatprep.subr.mxu1 %v2232_v43  ;;  %v3224_v32 = vand.u32 4294901760, %v3223_v21 }
  0xbe   :  { %1003 = vmatprep.subr.mxu0 %v3185_v1  ;;  %974 = vmatpush2.msra.mxu1 %v2243_v37  ;;  %v3226_v1 = vld [vmem:[#allocation44_spill] sm:$0xff] }
  0xbf   :  { %1007 = vmatpush1.msra.mxu0 %v3186_v26  ;;  %976 = vmatprep.subr.mxu1 %v3187_v20  ;;  %v3196_v26 = vand.u32 4294901760, %v1664_v59  ;;  %v3201_v59 = vand.u32 4294901760, %v1710_v48  ;;  %v3216_v48 = vld [vmem:[#allocation16_spill] sm:$0xff] }
  0xc0   :  { %1011 = vmatprep.subr.mxu0 %v3188_v27  ;;  %978 = vmatpush2.msra.mxu1 %v3189_v56  ;;  %v3198_v27 = vand.u32 4294901760, %v1676_v0  ;;  %v3202_v0 = vand.u32 4294901760, %v1724_v57 }
  0xc1   :  { %1015 = vmatpush1.msra.mxu0 %v3190_v30  ;;  %980 = vmatprep.subr.mxu1 %v3191_v34  ;;  %v3225_v30 = vld [vmem:[#allocation19_spill] sm:$0xff] }
  0xc2   :  { %1019 = vmatprep.subr.mxu0 %v3192_v18  ;;  %982 = vmatpush2.msra.mxu1 %v2298_v14  ;;  %v3232_v18 = vld [vmem:[#allocation48_spill] sm:$0xff] }
  0xc3   :  { %1023 = vmatpush1.msra.mxu0 %v3193_v23  ;;  %984 = vmatprep.subr.mxu1 %v2311_v2  ;;  %v3233_v23 = vand.u32 4294901760, %v3232_v18 }
  0xc4   :  { %1027 = vmatprep.subr.mxu0 %v3194_v25  ;;  %986 = vmatpush2.msra.mxu1 %v2327_v38  ;;  %v3234_v25 = vld [vmem:[#allocation22_spill] sm:$0xff] }
  0xc5   :  { %990 = vmatprep.mubr.f32.mxu1 %v3195_v31  ;;  %1031 = vmatpush1.msra.mxu0 %v3196_v26  ;;  %v3235_v31 = vld [vmem:[#allocation50_spill] sm:$0xff] }
  0xc6   :  { %994 = vmatmul.mubr.f32.vlgmr.msra.gmra.mxu1 %v3197_v35  ;;  %1035 = vmatprep.subr.mxu0 %v3198_v27  ;;  %v3236_v26 = vand.u32 4294901760, %v3235_v31  ;;  %v3237_v35 = vld [vmem:[#allocation23_spill] sm:$0xff]  ;;  %v3238_v27 = vld [vmem:[#allocation52_spill] sm:$0xff] }
  0xc7   :  { %1266 = vmatprep.subr.mxu1 %v1549_v3  ;;  %1039 = vmatpush1.msra.mxu0 %v3199_v40  ;;  %v3203_v3 = vand.u32 4294901760, %v1736_v6  ;;  %v3220_v6 = vld [vmem:[#allocation40_spill] sm:$0xff]  ;;  %v3239_v40 = vand.u32 4294901760, %v3238_v27 }
  0xc8   :  { %1268 = vmatpush1.msra.mxu1 %v1551_v4  ;;  %1043 = vmatprep.subr.mxu0 %v3200_v45  ;;  %v3204_v4 = vand.u32 4294901760, %v1757_v54  ;;  %v3217_v54 = vld [vmem:[#allocation38_spill] sm:$0xff]  ;;  %v3240_v45 = vld [vmem:[#allocation24_spill] sm:$0xff] }
  0xc9   :  { %1270 = vmatprep.subr.mxu1 %v1553_v5  ;;  %1047 = vmatpush1.msra.mxu0 %v3201_v59  ;;  %v3205_v5 = vand.u32 4294901760, %v1770_v63  ;;  %v3218_v57 = vand.u32 4294901760, %v3217_v54  ;;  %v3219_v63 = vld [vmem:[#allocation17_spill] sm:$0xff]  ;;  %v3241_v59 = vld [vmem:[#allocation54_spill] sm:$0xff] }
  0xca   :  { %1272 = vmatpush1.msra.mxu1 %v1555_v9  ;;  %1051 = vmatprep.subr.mxu0 %v3202_v0  ;;  %v3206_v9 = vand.u32 4294901760, %v1788_v55  ;;  %v3221_v55 = vand.u32 4294901760, %v3220_v6  ;;  %v3242_v0 = vand.u32 4294901760, %v3241_v59 }
  0xcb   :  { %1274 = vmatprep.subr.mxu1 %v1557_v10  ;;  %1055 = vmatpush1.msra.mxu0 %v3203_v3  ;;  %v3207_v10 = vand.u32 4294901760, %v1801_v58  ;;  %v3222_v58 = vld [vmem:[#allocation18_spill] sm:$0xff]  ;;  %v3243_v3 = vld [vmem:[#allocation25_spill] sm:$0xff] }
  0xcc   :  { %1276 = vmatpush1.msra.mxu1 %v1559_v11  ;;  %1059 = vmatprep.subr.mxu0 %v3204_v4  ;;  %v3208_v11 = vand.u32 4294901760, %v1813_v60  ;;  %v3244_v4 = vld [vmem:[#allocation56_spill] sm:$0xff] }
  0xcd   :  { %1278 = vmatprep.subr.mxu1 %v1562_v15  ;;  %1063 = vmatpush1.msra.mxu0 %v3205_v5  ;;  %v3209_v15 = vand.u32 4294901760, %v3107_v49  ;;  %v3228_v49 = vld [vmem:[#allocation20_spill] sm:$0xff]  ;;  %v3245_v5 = vand.u32 4294901760, %v3244_v4 }
  0xce   :  { %1280 = vmatpush1.msra.mxu1 %v1564_v16  ;;  %1067 = vmatprep.subr.mxu0 %v3206_v9  ;;  %v3210_v16 = vand.u32 4294901760, %v3109_v33  ;;  %v3246_v9 = vld [vmem:[#allocation26_spill] sm:$0xff] }
  0xcf   :  { %1282 = vmatprep.subr.mxu1 %v1566_v17  ;;  %1071 = vmatpush1.msra.mxu0 %v3207_v10  ;;  %v3211_v17 = vld [vmem:[#allocation34_spill] sm:$0xff] }
  0xd0   :  { %1284 = vmatpush1.msra.mxu1 %v1579_v22  ;;  %1075 = vmatprep.subr.mxu0 %v3208_v11  ;;  %v3212_v8 = vand.u32 4294901760, %v3211_v17  ;;  %v3214_v22 = vld [vmem:[#allocation36_spill] sm:$0xff]  ;;  %v3247_v10 = vld [vmem:[#allocation58_spill] sm:$0xff] }
  0xd1   :  { %1286 = vmatprep.subr.mxu1 %v3106_v24  ;;  %1079 = vmatpush1.msra.mxu0 %v3209_v15  ;;  %v3215_v60 = vand.u32 4294901760, %v3214_v22  ;;  %v3227_v24 = vand.u32 4294901760, %v3226_v1  ;;  %v3248_v11 = vand.u32 4294901760, %v3247_v10  ;;  %v3249_v15 = vld [vmem:[#allocation27_spill] sm:$0xff] }
  0xd2   :  { %1288 = vmatpush1.msra.mxu1 %v3108_v62  ;;  %1083 = vmatprep.subr.mxu0 %v3210_v16  ;;  %v3229_v62 = vld [vmem:[#allocation46_spill] sm:$0xff]  ;;  %v3250_v16 = vld [vmem:[#allocation60_spill] sm:$0xff]  ;;  %v3287_v10 = vld [vmem:[#allocation51_spill] sm:$0xff] }
  0xd3   :  { %1290 = vmatprep.subr.mxu1 %v3110_v51  ;;  %1087 = vmatpush1.msra.mxu0 %v3212_v8  ;;  %v3230_v33 = vand.u32 4294901760, %v3229_v62  ;;  %v3231_v51 = vld [vmem:[#allocation21_spill] sm:$0xff]  ;;  %v3251_v17 = vand.u32 4294901760, %v3250_v16  ;;  %v3252_v8 = vld [vmem:[#allocation28_spill] sm:$0xff]  ;;  %v3290_v16 = vld [vmem:[#allocation87_spill] sm:$0xff] }
  0xd4   :  { %1292 = vmatpush1.msra.mxu1 %v3213_v42  ;;  %1091 = vmatprep.subr.mxu0 %v3215_v60  ;;  %v3253_v42 = vld [vmem:[#allocation62_spill] sm:$0xff]  ;;  %v3255_v60 = vld [vmem:[#allocation29_spill] sm:$0xff] }
  0xd5   :  { %1294 = vmatprep.subr.mxu1 %v3216_v48  ;;  %1095 = vmatpush1.msra.mxu0 %v3218_v57  ;;  %v3254_v22 = vand.u32 4294901760, %v3253_v42  ;;  %v3256_v48 = vld [vmem:[#allocation64_spill] sm:$0xff]  ;;  %v3258_v57 = vld [vmem:[#allocation31_spill] sm:$0xff] }
  0xd6   :  { %1296 = vmatpush1.msra.mxu1 %v3219_v63  ;;  %1099 = vmatprep.subr.mxu0 %v3221_v55  ;;  %v3257_v54 = vand.u32 4294901760, %v3256_v48  ;;  %v3259_v63 = vld [vmem:[#allocation66_spill] sm:$0xff]  ;;  %v3261_v55 = vld [vmem:[#allocation33_spill] sm:$0xff] }
  0xd7   :  { %1298 = vmatprep.subr.mxu1 %v3222_v58  ;;  %1103 = vmatpush1.msra.mxu0 %v3224_v32  ;;  %v3260_v6 = vand.u32 4294901760, %v3259_v63  ;;  %v3262_v58 = vld [vmem:[#allocation68_spill] sm:$0xff]  ;;  %v3264_v32 = vld [vmem:[#allocation35_spill] sm:$0xff] }
  0xd8   :  { %1300 = vmatpush1.msra.mxu1 %v3225_v30  ;;  %1107 = vmatprep.subr.mxu0 %v3227_v24  ;;  %v3263_v21 = vand.u32 4294901760, %v3262_v58  ;;  %v3265_v30 = vld [vmem:[#allocation70_spill] sm:$0xff]  ;;  %v3267_v24 = vld [vmem:[#allocation37_spill] sm:$0xff] }
  0xd9   :  { %1302 = vmatprep.subr.mxu1 %v3228_v49  ;;  %1111 = vmatpush1.msra.mxu0 %v3230_v33  ;;  %v3266_v1 = vand.u32 4294901760, %v3265_v30  ;;  %v3268_v49 = vld [vmem:[#allocation72_spill] sm:$0xff]  ;;  %v3270_v33 = vld [vmem:[#allocation39_spill] sm:$0xff] }
  0xda   :  { %1304 = vmatpush1.msra.mxu1 %v3231_v51  ;;  %1115 = vmatprep.subr.mxu0 %v3233_v23  ;;  %v3269_v62 = vand.u32 4294901760, %v3268_v49  ;;  %v3271_v51 = vld [vmem:[#allocation74_spill] sm:$0xff]  ;;  %v3273_v23 = vld [vmem:[#allocation41_spill] sm:$0xff]  ;;  %v3320_v49 = vld [vmem:[#allocation83_spill] sm:$0xff] }
  0xdb   :  { %1306 = vmatprep.subr.mxu1 %v3234_v25  ;;  %1119 = vmatpush1.msra.mxu0 %v3236_v26  ;;  %v3272_v18 = vand.u32 4294901760, %v3271_v51  ;;  %v3274_v25 = vld [vmem:[#allocation76_spill] sm:$0xff]  ;;  %v3276_v26 = vld [vmem:[#allocation43_spill] sm:$0xff] }
  0xdc   :  { %1308 = vmatpush1.msra.mxu1 %v3237_v35  ;;  %1123 = vmatprep.subr.mxu0 %v3239_v40  ;;  %v3275_v31 = vand.u32 4294901760, %v3274_v25  ;;  %v3277_v35 = vld [vmem:[#allocation78_spill] sm:$0xff]  ;;  %v3279_v40 = vld [vmem:[#allocation45_spill] sm:$0xff] }
  0xdd   :  { %1310 = vmatprep.subr.mxu1 %v3240_v45  ;;  %1127 = vmatpush1.msra.mxu0 %v3242_v0  ;;  %v3278_v27 = vand.u32 4294901760, %v3277_v35  ;;  %v3280_v45 = vld [vmem:[#allocation80_spill] sm:$0xff]  ;;  %v3282_v0 = vld [vmem:[#allocation47_spill] sm:$0xff] }
  0xde   :  { %1312 = vmatpush1.msra.mxu1 %v3243_v3  ;;  %1131 = vmatprep.subr.mxu0 %v3245_v5  ;;  %v3281_v59 = vand.u32 4294901760, %v3280_v45  ;;  %v3283_v3 = vld [vmem:[#allocation82_spill] sm:$0xff]  ;;  %v3285_v5 = vld [vmem:[#allocation84_spill] sm:$0xff] }
  0xdf   :  { %1314 = vmatprep.subr.mxu1 %v3246_v9  ;;  %1135 = vmatpush2.msra.mxu0 %v3248_v11  ;;  %v3284_v4 = vand.u32 4294901760, %v3283_v3  ;;  %v3286_v9 = vand.u32 4294901760, %v3285_v5  ;;  %v3288_v11 = vld [vmem:[#allocation86_spill] sm:$0xff] }
  0xe0   :  { %1316 = vmatpush1.msra.mxu1 %v3249_v15  ;;  %1139 = vmatprep.subr.mxu0 %v3251_v17  ;;  %v3289_v15 = vand.u32 4294901760, %v3288_v11  ;;  %v3291_v17 = vand.u32 4294901760, %v3290_v16 }
  0xe1   :  { %1318 = vmatprep.subr.mxu1 %v3252_v8  ;;  %1143 = vmatpush2.msra.mxu0 %v3254_v22  ;;  %v3292_v8 = vld [vmem:[#allocation88_spill] sm:$0xff] }
  0xe2   :  { %1320 = vmatpush1.msra.mxu1 %v3255_v60  ;;  %1147 = vmatprep.subr.mxu0 %v3257_v54  ;;  %v3293_v42 = vand.u32 4294901760, %v3292_v8  ;;  %v3296_v60 = vld [vmem:[#allocation92_spill] sm:$0xff] }
  0xe3   :  { %1322 = vmatprep.subr.mxu1 %v3258_v57  ;;  %1151 = vmatpush2.msra.mxu0 %v3260_v6  ;;  %v3297_v48 = vand.u32 4294901760, %v3296_v60 }
  0xe4   :  { %1324 = vmatpush1.msra.mxu1 %v3261_v55  ;;  %1155 = vmatprep.subr.mxu0 %v3263_v21 }
  0xe5   :  { %1326 = vmatprep.subr.mxu1 %v3264_v32  ;;  %1159 = vmatpush2.msra.mxu0 %v3266_v1  ;;  %v3317_v1 = vld [vmem:[#allocation81_spill] sm:$0xff] }
  0xe6   :  { %1328 = vmatpush1.msra.mxu1 %v3267_v24  ;;  %1163 = vmatprep.subr.mxu0 %v3269_v62  ;;  %v3323_v62 = vld [vmem:[#allocation98_spill] sm:$0xff] }
  0xe7   :  { %1330 = vmatprep.subr.mxu1 %v3270_v33  ;;  %1167 = vmatpush2.msra.mxu0 %v3272_v18  ;;  %v3325_v33 = vld [vmem:[#allocation100_spill] sm:$0xff] }
  0xe8   :  { %1332 = vmatpush2.msra.mxu1 %v3273_v23  ;;  %1171 = vmatprep.subr.mxu0 %v3275_v31 }
  0xe9   :  { %1334 = vmatprep.subr.mxu1 %v3276_v26  ;;  %1175 = vmatpush2.msra.mxu0 %v3278_v27 }
  0xea   :  { %1336 = vmatpush2.msra.mxu1 %v3279_v40  ;;  %1179 = vmatprep.subr.mxu0 %v3281_v59 }
  0xeb   :  { %1338 = vmatprep.subr.mxu1 %v3282_v0  ;;  %1183 = vmatpush2.msra.mxu0 %v3284_v4 }
  0xec   :  { %1340 = vmatpush2.msra.mxu1 %v3160_v52  ;;  %1187 = vmatprep.subr.mxu0 %v3286_v9  ;;  %v3294_v52 = vld [vmem:[#allocation90_spill] sm:$0xff] }
  0xed   :  { %1342 = vmatprep.subr.mxu1 %v3287_v10  ;;  %1191 = vmatpush2.msra.mxu0 %v3289_v15  ;;  %v3295_v22 = vand.u32 4294901760, %v3294_v52 }
  0xee   :  { %1344 = vmatpush2.msra.mxu1 %v3164_v39  ;;  %1195 = vmatprep.subr.mxu0 %v3291_v17  ;;  %v3298_v39 = vld [vmem:[#allocation94_spill] sm:$0xff] }
  0xef   :  { %1346 = vmatprep.subr.mxu1 %v3166_v53  ;;  %1199 = vmatpush2.msra.mxu0 %v3293_v42  ;;  %v3299_v54 = vand.u32 4294901760, %v3298_v39  ;;  %v3300_v53 = vld [vmem:[#allocation95_spill] sm:$0xff] }
  0xf0   :  { %1348 = vmatpush2.msra.mxu1 %v3168_v61  ;;  %1203 = vmatprep.subr.mxu0 %v3295_v22  ;;  %v3301_v57 = vand.u32 4294901760, %v3300_v53  ;;  %v3302_v61 = vld [vmem:[#allocation96_spill] sm:$0xff] }
  0xf1   :  { %1350 = vmatprep.subr.mxu1 %v3170_v44  ;;  %1207 = vmatpush2.msra.mxu0 %v3297_v48  ;;  %v3303_v63 = vand.u32 4294901760, %v3302_v61  ;;  %v3304_v44 = vld [vmem:[#allocation97_spill] sm:$0xff] }
  0xf2   :  { %1352 = vmatpush2.msra.mxu1 %v3171_v41  ;;  %1211 = vmatprep.subr.mxu0 %v3299_v54  ;;  %v3305_v6 = vand.u32 4294901760, %v3304_v44  ;;  %v3306_v41 = vld [vmem:[#allocation99_spill] sm:$0xff] }
  0xf3   :  { %1354 = vmatprep.subr.mxu1 %v3173_v7  ;;  %1215 = vmatpush2.msra.mxu0 %v3301_v57  ;;  %v3307_v55 = vand.u32 4294901760, %v3306_v41  ;;  %v3308_v7 = vld [vmem:[#allocation101_spill] sm:$0xff] }
  0xf4   :  { %1356 = vmatpush2.msra.mxu1 %v3174_v28  ;;  %1219 = vmatprep.subr.mxu0 %v3303_v63  ;;  %v3309_v58 = vand.u32 4294901760, %v3308_v7  ;;  %v3310_v28 = vld [vmem:[#allocation102_spill] sm:$0xff] }
  0xf5   :  { %1358 = vmatprep.subr.mxu1 %v3175_v19  ;;  %1223 = vmatpush2.msra.mxu0 %v3305_v6  ;;  %v3311_v21 = vand.u32 4294901760, %v3310_v28  ;;  %v3312_v19 = vand.u32 4294901760, %v2374_v13 }
  0xf6   :  { %1360 = vmatpush2.msra.mxu1 %v3176_v29  ;;  %1227 = vmatprep.subr.mxu0 %v3307_v55  ;;  %v3313_v29 = vld [vmem:[#allocation103_spill] sm:$0xff] }
  0xf7   :  { %1362 = vmatprep.subr.mxu1 %v3177_v50  ;;  %1231 = vmatpush2.msra.mxu0 %v3309_v58  ;;  %v3314_v32 = vand.u32 4294901760, %v3313_v29  ;;  %v3315_v50 = vld [vmem:[#allocation104_spill] sm:$0xff] }
  0xf8   :  { %1364 = vmatpush2.msra.mxu1 %v3178_v12  ;;  %1235 = vmatprep.subr.mxu0 %v3311_v21  ;;  %v3316_v30 = vand.u32 4294901760, %v3315_v50  ;;  %v3318_v12 = vld [vmem:[#allocation105_spill] sm:$0xff] }
  0xf9   :  { %1366 = vmatprep.subr.mxu1 %v3179_v36  ;;  %1239 = vmatpush2.msra.mxu0 %v3312_v19  ;;  %v3319_v24 = vand.u32 4294901760, %v3318_v12  ;;  %v3321_v36 = vld [vmem:[#allocation106_spill] sm:$0xff] }
  0xfa   :  { %1368 = vmatpush2.msra.mxu1 %v3180_v46  ;;  %1243 = vmatprep.subr.mxu0 %v3314_v32  ;;  %v3322_v13 = vand.u32 4294901760, %v3321_v36  ;;  %v3324_v46 = vld [vmem:[#allocation85_spill] sm:$0xff] }
  0xfb   :  { %1370 = vmatprep.subr.mxu1 %v3181_v47  ;;  %1247 = vmatpush2.msra.mxu0 %v3316_v30 }
  0xfc   :  { %1372 = vmatpush2.msra.mxu1 %v3317_v1  ;;  %1251 = vmatprep.subr.mxu0 %v3319_v24 }
  0xfd   :  { %1374 = vmatprep.subr.mxu1 %v3320_v49  ;;  %1255 = vmatpush2.msra.mxu0 %v3322_v13 }
  0xfe   :  { %1257 = vmatprep.mubr.f32.mxu0 %v3323_v62  ;;  %1376 = vmatpush2.msra.mxu1 %v3324_v46 }
  0xff   :  { %1259 = vmatmul.mubr.f32.vlgmr.msra.gmra.mxu0 %v3325_v33  ;;  %1378 = vmatprep.subr.mxu1 %v2232_v43 }
 0x100   :  { %1394 = vmatprep.mubr.f32.mxu1 %v3323_v62  ;;  %1380 = vmatpush2.msra.mxu1 %v2243_v37 }
 0x101   :  { %1382 = vmatprep.subr.mxu1 %v3187_v20 }
 0x102   :  { %1384 = vmatpush2.msra.mxu1 %v3189_v56 }
 0x103   :  { %1386 = vmatprep.subr.mxu1 %v3191_v34 }
 0x104   :  { %1388 = vmatpush2.msra.mxu1 %v2298_v14 }
 0x105   :  { %1390 = vmatprep.subr.mxu1 %v2311_v2 }
 0x106   :  { %1392 = vmatpush2.msra.mxu1 %v2327_v38 }
 0x107   :  { %1396 = vmatmul.mubr.f32.vlgmr.msra.gmra.mxu1 %v3325_v33 }
 0x13d   :  { %v258_v47 = vpop.f32.mrf.mxu0 }
 0x13f   :  { %v260_v43 = vpop.f32.mrf.mxu0 }
 0x144   :  { %v651_v51 = vpop.f32.mrf.mxu1 }
 0x145   :  { %v652_v20 = vadd.f32 %v651_v51, %v258_v47 }
 0x146   :  { %v653_v23 = vpop.f32.mrf.mxu1 }
 0x147   :  { %v654_v56 = vadd.f32 %v653_v23, %v260_v43 }
 0x17d   :  { %v854_v18 = vpop.f32.mrf.mxu0 }
 0x17e   :  { %v855_v26 = vadd.f32 %v854_v18, %v652_v20 }
 0x17f   :  { %v856_v37 = vpop.f32.mrf.mxu0 }
 0x180   :  { %v857_v35 = vadd.f32 %v856_v37, %v654_v56 }
 0x186   :  { %v995_v25 = vpop.f32.mrf.mxu1 }
 0x187   :  { %v996_v14 = vadd.f32 %v995_v25, %v855_v26 }
 0x188   :  { %v997_v34 = vpop.f32.mrf.mxu1 }
 0x189   :  { %v998_v2 = vadd.f32 %v997_v34, %v857_v35 }
 0x1bf   :  { %v1260_v31 = vpop.f32.mrf.mxu0 }
 0x1c0   :  { %v1261_v40 = vadd.f32 %v1260_v31, %v996_v14 }
 0x1c1   :  { %v1262_v27 = vpop.f32.mrf.mxu0 }
 0x1c2   :  { %v1263_v45 = vadd.f32 %v1262_v27, %v998_v2 }
 0x1c7   :  { %v1397_v38 = vpop.f32.mrf.mxu1 }
 0x1c8   :  { %v1398_v59 = vadd.f32 %v1397_v38, %v1261_v40 }
 0x1c9   :  { %v1399_v0 = vpop.f32.mrf.mxu1 }
 0x1ca   :  { %v1402_v3 = vmul.f32 0.70710677, %v1398_v59  ;;  %v1400_v4 = vadd.f32 %v1399_v0, %v1263_v45 }
 0x1cc   :  { %1404 = vst [vmem:[#allocation8] sm:$0xff] %v1402_v3  ;;  %v1403_v5 = vmul.f32 0.70710677, %v1400_v4 }
 0x1ce   :  { %1405 = vst [vmem:[#allocation8 + $0x8] sm:$0xff] %v1403_v5 }
 0x1cf   :  { %1499 = shalt.err (!%p1496_p5)
}
 0x1d0   :  { %1415 = dma.vmem_to_hbm [thread:$0]  %s1413_s2, 256, %s2765_s3, [#allocation4]  }
 0x1d1   :  { %1512 = dma.done.wait [#allocation4], 256  }
 0x1d2   :  { %1513 = vsyncadd [#allocation4], 4294967040 }
 0x1d3   :  { %1419 = vsyncpa [#allocation3], 1 }
 0x1d4   :  { %1420 = vsyncpa [#allocation6], 1 }
 0x1d5   :  { %1421 = vsyncpa [#allocation4], 1 }

</bundles_post_ra>
